<compile_context>
chip_gen: v5e
topology: v5e:2x2
jax: 0.10.0
libtpu: 0.0.40
codegen_flags: <defaults>
</compile_context>

<pallas_src>
import jax
import jax.numpy as jnp
from jax.experimental import pallas as pl
from jax.experimental.pallas import tpu as pltpu


_LANES = 128
_TARGET_BLOCK_BYTES = 4 * 1024 * 1024      # ~4 MiB per input buffer
_VMEM_LIMIT_BYTES = 32 * 1024 * 1024       # 3 arrays x 2 bufs x 4 MiB = 24 MiB
_SMALL_INPUT_BYTES = 1 * 1024 * 1024       # below this, plain jnp wins


def _add_kernel(x_ref, y_ref, out_ref):
    # Single fused elementwise add on the VPU; the kernel is pure HBM streaming.
    out_ref[...] = x_ref[...] + y_ref[...]


def _pallas_add_2d(x2, y2):
    """x2, y2: (rows, 128) lane-dense slabs. Returns x2 + y2 via pallas_call."""
    rows, lanes = x2.shape
    itemsize = jnp.dtype(x2.dtype).itemsize

    # Byte-budget block sizing: ~4 MiB / buffer, multiple of 8 sublanes.
    block_rows = max(8, (_TARGET_BLOCK_BYTES // (lanes * itemsize)) // 8 * 8)

    # Guarantee >= 2 grid steps when there is enough work so the "parallel"
    # axis shards across both v7x TensorCores.
    if rows >= 16:
        half_rows = pl.cdiv(pl.cdiv(rows, 2), 8) * 8   # multiple of 8, <= rows
        block_rows = min(block_rows, half_rows)
    block_rows = min(block_rows, rows)                 # full-extent if tiny

    grid = (pl.cdiv(rows, block_rows),)

    cost = pl.CostEstimate(
        flops=rows * lanes,
        transcendentals=0,
        bytes_accessed=3 * rows * lanes * itemsize,    # 2 reads + 1 write
    )

    return pl.pallas_call(
        _add_kernel,
        out_shape=jax.ShapeDtypeStruct((rows, lanes), x2.dtype),
        grid=grid,
        in_specs=[
            pl.BlockSpec((block_rows, lanes), lambda i: (i, 0)),
            pl.BlockSpec((block_rows, lanes), lambda i: (i, 0)),
        ],
        out_specs=pl.BlockSpec((block_rows, lanes), lambda i: (i, 0)),
        compiler_params=pltpu.CompilerParams(
            dimension_semantics=("parallel",),
            vmem_limit_bytes=_VMEM_LIMIT_BYTES,
        ),
        cost_estimate=cost,
    )(x2, y2)


def multi_identity(x_and_y):
    """JAX/Pallas equivalent of MultiIdentity.forward: (x, y) -> (x, x + y)."""
    x, y = x_and_y
    assert x.shape == y.shape and x.dtype == y.dtype
    orig_shape = x.shape
    n_elem = x.size
    itemsize = jnp.dtype(x.dtype).itemsize

    # --- small-input fast path: launch/plumbing overhead dwarfs the work ----
    if n_elem * itemsize < _SMALL_INPUT_BYTES or n_elem < _LANES:
        return x, x + y

    xf = x.reshape(-1)
    yf = y.reshape(-1)

    main = (n_elem // _LANES) * _LANES
    tail = n_elem - main
    rows = main // _LANES

    main_sum = _pallas_add_2d(xf[:main].reshape(rows, _LANES),
                              yf[:main].reshape(rows, _LANES))
    out_flat = main_sum.reshape(-1)
    if tail:
        # Tiny ragged tail (< 128 elems) via XLA; avoids whole-array jnp.pad
        # and the output re-slice copy of the previous version.
        out_flat = jnp.concatenate([out_flat, xf[main:] + yf[main:]])

    # Identity branch: return x itself (exactly what torch.nn.Identity does).
    return x, out_flat.reshape(orig_shape)


def _check(shape, dtype=jnp.float32, seed=0):
    key = jax.random.PRNGKey(seed)
    kx, ky = jax.random.split(key)
    x = jax.random.normal(kx, shape, dtype=dtype)
    y = jax.random.normal(ky, shape, dtype=dtype)
    out_x, out_sum = multi_identity((x, y))
    jax.block_until_ready((out_x, out_sum))
    assert out_x.shape == x.shape and out_sum.shape == x.shape
    assert jnp.array_equal(out_x, x)
    assert jnp.allclose(out_sum, x + y, atol=1e-6, rtol=1e-6)


if __name__ == "__main__":
    # 1) Small NCHW-shaped input consistent with the module's forward
    #    (takes the tiny-input fast path).
    _check((2, 4, 16, 16))
    # 2) Larger 128-divisible input: exercises the Pallas kernel's no-copy
    #    path with a multi-step, both-TensorCore grid.
    _check((4, 8, 128, 128))
    # 3) Ragged size (n % 128 != 0): kernel on the aligned prefix + jnp tail.
    _check((7, 211, 211))

    print("KERNEL_OK")
</pallas_src>

<mosaic_0001>
module attributes {stable_mosaic.version = 11 : i64} {
  func.func @_add_kernel(%arg0: i32, %arg1: memref<2048x128xf32, #tpu.memory_space<vmem>>, %arg2: memref<2048x128xf32, #tpu.memory_space<vmem>>, %arg3: memref<2048x128xf32, #tpu.memory_space<vmem>>) attributes {dimension_semantics = [#tpu.dimension_semantics<parallel>], iteration_bounds = array<i64: 2>, scalar_prefetch = 0 : i64, scratch_operands = 0 : i64, tpu.core_type = #tpu.core_type<tc>, window_params = [{transform_indices = @transform_0, window_bounds = array<i64: 2048, 128>}, {transform_indices = @transform_1, window_bounds = array<i64: 2048, 128>}, {transform_indices = @transform_2, window_bounds = array<i64: 2048, 128>}]} {
    %c0 = arith.constant 0 : index
    %c0_0 = arith.constant 0 : index
    %0 = vector.load %arg1[%c0, %c0_0] : memref<2048x128xf32, #tpu.memory_space<vmem>>, vector<2048x128xf32>
    %c0_1 = arith.constant 0 : index
    %c0_2 = arith.constant 0 : index
    %1 = vector.load %arg2[%c0_1, %c0_2] : memref<2048x128xf32, #tpu.memory_space<vmem>>, vector<2048x128xf32>
    %2 = arith.addf %0, %1 : vector<2048x128xf32>
    %c0_3 = arith.constant 0 : index
    %c0_4 = arith.constant 0 : index
    %3 = vector.load %arg3[%c0_3, %c0_4] : memref<2048x128xf32, #tpu.memory_space<vmem>>, vector<2048x128xf32>
    tpu.vector_store %arg3[%c0_3, %c0_4], %2 {strides = array<i32>} : memref<2048x128xf32, #tpu.memory_space<vmem>>, vector<2048x128xf32>,
    return
  }
  func.func @transform_0(%arg0: i32) -> (i32, i32) {
    %c0_i32 = arith.constant 0 : i32
    %c0_i32_0 = arith.constant 0 : i32
    return %arg0, %c0_i32 : i32, i32
  }
  func.func @transform_1(%arg0: i32) -> (i32, i32) {
    %c0_i32 = arith.constant 0 : i32
    %c0_i32_0 = arith.constant 0 : i32
    return %arg0, %c0_i32 : i32, i32
  }
  func.func @transform_2(%arg0: i32) -> (i32, i32) {
    %c0_i32 = arith.constant 0 : i32
    %c0_i32_0 = arith.constant 0 : i32
    return %arg0, %c0_i32 : i32, i32
  }
}

</mosaic_0001>

<bundles_post_ra>
// kernel: tpu_custom_call.1
= control target key start
LH: loop header
LB: loop body
LE: loop exit
PB: predicated region body
PF: predicated region fallthrough
CT: control target
= control target key end

     0   :  { %7 = vsyncpa [#allocation3], 0  ;;  %s2515_s0 = inlined_call_operand.hbm [shape: f32[4096,128], index: 0, kind: input, shape index: {}]   ;;  %s2516_s1 = inlined_call_operand.hbm [shape: f32[4096,128], index: 1, kind: input, shape index: {}]   ;;  %s2517_s2 = inlined_call_operand.hbm [shape: f32[4096,128], index: 2, kind: output, shape index: {}]  }
   0x1   :  { %9 = vsyncpa [#allocation3 + $0x1], 0 }
   0x2   :  { %10 = vsyncpa [#allocation6], 0 }
   0x3   :  { %12 = vsyncpa [#allocation6 + $0x1], 0 }
   0x4   :  { %13 = vsyncpa [#allocation4], 0 }
   0x5   :  { %15 = vsyncpa [#allocation4 + $0x1], 0  ;;  %s1572_s9 = smov 0   ;;  %s1574_s10 = smov 0  }
   0x6   :  { %s1576_s11 = smov 0   ;;  %s1578_s12 = smov 0  }
   0x7 LB: > { %s1593_s13 = sadd.s32 4294967295, %s1551_s12   ;;  %s1345_s14 = sadd.s32 4294967294, %s1551_s12   ;;  %s1551_s12 = sphi %s1578_s12, %s2528_s12   ;;  %s1547_s11 = sphi %s1576_s11, %s2527_s11   ;;  %s1543_s10 = sphi %s1574_s10, %s2526_s10   ;;  %s1539_s9 = sphi %s1572_s9, %s2525_s9  }
   0x8   : > { %s1597_s15 = sadd.s32 1, %s1551_s12   ;;  %s28_s16 = sadd.s32 1, %s1547_s11 }
   0x9   : > { %s25_s17 = ssub.s32 %s1551_s12, %s1597_s15  ;;  %p35_p0 = scmp.ne.s32.totalorder %s1547_s11, %s1543_s10 }
   0xa   : > { %p26_p1 = scmp.eq.s32.totalorder %s25_s17, 0  ;;  %p36_p2 = scmp.eq.s32.totalorder %s1551_s12, 0 }
   0xb   : > { %p41_p3 = scmp.ne.s32.totalorder %s1543_s10, %s1539_s9  ;;  %p42_p4 = scmp.eq.s32.totalorder %s1593_s13, 0 }
   0xc   : > { %s1609_s18 = scalar_select %p26_p1, %s1547_s11, %s28_s16  }
   0xd   : > { %p1611_p5 = por %p36_p2, %p35_p0  ;;  %p1615_p6 = por %p42_p4, %p41_p3 }
   0xe   : > { %p91_p7 = scmp.eq.s32.totalorder %s1593_s13, 1  ;;  %p97_p8 = scmp.eq.s32.totalorder %s1345_s14, 1 }
   0xf   : > { %p1383_p10 = scmp.lt.s32.totalorder %s1551_s12, 2  ;;  %s1631_s23 = sand.u32 1, %s1547_s11  }
  0x10   : > { %p1622_p11 = por %p91_p7, %p35_p0  ;;  %p1626_p12 = por %p97_p8, %p41_p3 }
  0x11   : > { %s1363_s24 = sshll.u32 %s1551_s12, 11  ;;  %s1348_s25 = sshll.u32 %s1631_s23, 11 }
  0x12   : > { %s126_s28 = scalar_lea.hbm %s2515_s0, %s1363_s24  ;;  %s121_s30 = scalar_lea.vmem [#allocation2], %s1348_s25 }
  0x13   : > { %s127_s29 = sshll.u32 %s126_s28, 4  ;;  %s129_s3 = sshll.u32 %s121_s30, 4  ;;  %s128_s29 = int_to_ptr.hbm [resolvable:$true] %s127_s29  ;;  %s130_s3 = int_to_ptr.vmem [resolvable:$true] %s129_s3 }
  0x14   : > { %p1644_p13 = pnand %p1383_p10, %p1611_p5  ;;  %p1354_p0 = scmp.ge.s32.totalorder %s1551_s12, 1 }
  0x15   : > { %p159_p1 = scmp.lt.s32.totalorder %s1551_s12, 3  ;;  %s118_s5 = scalar_lea.sflag [#allocation3], %s1631_s23 }
  0x16   : > { %s1421_s6 = sshra.s32 %s128_s29, 4  ;;  %p1425_p3 = pneg %p1644_p13  ;;  %s1422_s6 = int_to_ptr.hbm [resolvable:$true] %s1421_s6 }
  0x17   : > { %s1423_s7 = scalar_lea.hbm %s1422_s6, 2048  ;;  %s1428_s16 = scalar_lea.hbm %s2515_s0, 4096 }
  0x18   : > { %p1424_p2 = scmp.ne.s32.totalorder %s1422_s6, %s1423_s7  ;;  %p1429_p5 = scmp.lt.s32.totalorder %s1422_s6, %s2515_s0 }
  0x19   : > { %p1430_p8 = scmp.lt.s32.totalorder %s1428_s16, %s1423_s7 }
  0x1a   : > { %p1426_p4 = pnand %p1425_p3, %p1424_p2 }
  0x1b   : > { %p1431_p10 = por %p1430_p8, %p1429_p5 }
  0x1c   : > { %p1427_p7 = pneg %p1426_p4 }
  0x1e   : > { %p1432_p9 = pnand %p1431_p10, %p1427_p7 }
  0x20   : > { %1435 = shalt.err (!%p1432_p9)
}
  0x21   : > { %s1553_s26 = smov 128   ;;  %s1554_s27 = smov 8  }
  0x22   : > { %1375 = dma.hbm_to_vmem [thread:$0]  (!%p1644_p13), %s128_s29, 32768, %s130_s3, %s118_s5, %s1553_s26, %s1553_s26, %s1554_s27  }
  0x23   : > { %p1668_p2 = pnand %p1354_p0, %p159_p1  ;;  %s148_s7 = scalar_lea.hbm %s2516_s1, %s1363_s24 }
  0x24   : > { %s149_s8 = sshll.u32 %s148_s7, 4  ;;  %s143_s14 = scalar_lea.vmem [#allocation5], %s1348_s25  ;;  %s150_s8 = int_to_ptr.hbm [resolvable:$true] %s149_s8 }
  0x25   : > { %s151_s16 = sshll.u32 %s143_s14, 4  ;;  %s140_s17 = scalar_lea.sflag [#allocation6], %s1631_s23  ;;  %s152_s16 = int_to_ptr.vmem [resolvable:$true] %s151_s16 }
  0x26   : > { %s1451_s19 = sshra.s32 %s150_s8, 4  ;;  %s1458_s30 = scalar_lea.hbm %s2516_s1, 4096  ;;  %s1452_s19 = int_to_ptr.hbm [resolvable:$true] %s1451_s19 }
  0x27   : > { %s1453_s29 = scalar_lea.hbm %s1452_s19, 2048  ;;  %p1459_p4 = scmp.lt.s32.totalorder %s1452_s19, %s2516_s1 }
  0x28   : > { %p1454_p9 = scmp.ne.s32.totalorder %s1452_s19, %s1453_s29  ;;  %p1460_p7 = scmp.lt.s32.totalorder %s1458_s30, %s1453_s29 }
  0x2a   : > { %p1456_p0 = pnand %p1454_p9, %p1425_p3  ;;  %p1461_p5 = por %p1460_p7, %p1459_p4 }
  0x2c   : > { %p1457_p1 = pneg %p1456_p0 }
  0x2e   : > { %p1462_p8 = pnand %p1461_p5, %p1457_p1 }
  0x30   : > { %1465 = shalt.err (!%p1462_p8)
}
  0x31   : > { %1378 = dma.hbm_to_vmem [thread:$0]  (!%p1644_p13), %s150_s8, 32768, %s152_s16, %s140_s17, %s1553_s26, %s1553_s26, %s1554_s27  }
  0x32   : > { %163 = sbr.rel (%p1668_p2) target bundleno = 321 (0x141), region = 28  ;;  %s1694_s23 = sand.u32 (!%p1668_p2), 1, %s1543_s10  }
  0x33   : > { %s1355_s25 = sshll.u32 (!%p1668_p2), %s1694_s23, 11  ;;  %s166_s7 = scalar_lea.sflag (!%p1668_p2), [#allocation3], %s1694_s23 }
  0x34   : > { %s1698_s14 = scalar_lea.vmem (!%p1668_p2), [#allocation2], %s1355_s25 }
  0x37   : > { %1526 = dma.done.wait (%p1615_p6), %s166_s7, 32768  }
  0x38   : > { %1528 = vsyncadd (%p1615_p6), %s166_s7, 4294934528  ;;  %s176_s4 = scalar_lea.sflag [#allocation6], %s1694_s23  ;;  %s1705_s26 = scalar_lea.vmem [#allocation5], %s1355_s25 }
  0x39   : > { %1530 = dma.done.wait (%p1615_p6), %s176_s4, 32768  }
  0x3a   : > { %1532 = vsyncadd (%p1615_p6), %s176_s4, 4294934528  ;;  %v209_v0 = vld [vmem:[%s1698_s14] sm:$0xff]  ;;  %v210_v2 = vld [vmem:[%s1698_s14 + $0x8] sm:$0xff]  ;;  %s1720_s20 = scalar_lea.vmem [#allocation7], %s1355_s25  ;;  %s1365_s27 = sshll.u32 %s1593_s13, 11 }
  0x3b   : > { %v465_v1 = vld [vmem:[%s1705_s26] sm:$0xff]  ;;  %v466_v4 = vld [vmem:[%s1705_s26 + $0x8] sm:$0xff]  ;;  %v211_v5 = vld [vmem:[%s1698_s14 + $0x10] sm:$0xff]  ;;  %s1245_s8 = scalar_lea.hbm %s2517_s2, %s1365_s27  ;;  %s1246_s16 = sshll.u32 %s1720_s20, 4  ;;  %s1247_s16 = int_to_ptr.vmem [resolvable:$true] %s1246_s16 }
  0x3c   : > { %v721_v3 = vadd.f32 %v465_v1, %v209_v0  ;;  %v467_v6 = vld [vmem:[%s1705_s26 + $0x10] sm:$0xff]  ;;  %v722_v7 = vadd.f32 %v466_v4, %v210_v2  ;;  %v212_v9 = vld [vmem:[%s1698_s14 + $0x18] sm:$0xff]  ;;  %v213_v11 = vld [vmem:[%s1698_s14 + $0x20] sm:$0xff]  ;;  %s1248_s17 = sshll.u32 %s1245_s8, 4  ;;  %s1234_s19 = scalar_lea.sflag [#allocation4], %s1694_s23  ;;  %s1249_s17 = int_to_ptr.hbm [resolvable:$true] %s1248_s17 }
  0x3d   : > { %v723_v8 = vadd.f32 %v467_v6, %v211_v5  ;;  %v468_v10 = vld [vmem:[%s1705_s26 + $0x18] sm:$0xff]  ;;  %v469_v13 = vld [vmem:[%s1705_s26 + $0x20] sm:$0xff]  ;;  %v214_v14 = vld [vmem:[%s1698_s14 + $0x28] sm:$0xff]  ;;  %s1495_s29 = sshra.s32 %s1249_s17, 4  ;;  %s1501_s24 = scalar_lea.hbm %s2517_s2, 4096  ;;  %s1496_s29 = int_to_ptr.hbm [resolvable:$true] %s1495_s29 }
  0x3e   : > { %977 = vst [vmem:[%s1720_s20] sm:$0xff] %v721_v3  ;;  %v724_v12 = vadd.f32 %v468_v10, %v212_v9  ;;  %v470_v15 = vld [vmem:[%s1705_s26 + $0x28] sm:$0xff]  ;;  %v725_v16 = vadd.f32 %v469_v13, %v213_v11  ;;  %v215_v18 = vld [vmem:[%s1698_s14 + $0x30] sm:$0xff]  ;;  %v216_v20 = vld [vmem:[%s1698_s14 + $0x38] sm:$0xff]  ;;  %s1497_s3 = scalar_lea.hbm %s1496_s29, 2048  ;;  %p1502_p10 = scmp.lt.s32.totalorder %s1496_s29, %s2517_s2 }
  0x3f   : > { %978 = vst [vmem:[%s1720_s20 + $0x8] sm:$0xff] %v722_v7  ;;  %v726_v17 = vadd.f32 %v470_v15, %v214_v14  ;;  %v471_v19 = vld [vmem:[%s1705_s26 + $0x30] sm:$0xff]  ;;  %v472_v22 = vld [vmem:[%s1705_s26 + $0x38] sm:$0xff]  ;;  %v217_v23 = vld [vmem:[%s1698_s14 + $0x40] sm:$0xff]  ;;  %p1498_p6 = scmp.ne.s32.totalorder %s1496_s29, %s1497_s3  ;;  %p1503_p2 = scmp.lt.s32.totalorder %s1501_s24, %s1497_s3 }
  0x40   : > { %979 = vst [vmem:[%s1720_s20 + $0x10] sm:$0xff] %v723_v8  ;;  %v727_v21 = vadd.f32 %v471_v19, %v215_v18  ;;  %v473_v24 = vld [vmem:[%s1705_s26 + $0x40] sm:$0xff]  ;;  %v728_v25 = vadd.f32 %v472_v22, %v216_v20  ;;  %v218_v26 = vld [vmem:[%s1698_s14 + $0x48] sm:$0xff]  ;;  %v219_v28 = vld [vmem:[%s1698_s14 + $0x50] sm:$0xff] }
  0x41   : > { %980 = vst [vmem:[%s1720_s20 + $0x18] sm:$0xff] %v724_v12  ;;  %v474_v27 = vld [vmem:[%s1705_s26 + $0x48] sm:$0xff]  ;;  %v729_v29 = vadd.f32 %v473_v24, %v217_v23  ;;  %v475_v30 = vld [vmem:[%s1705_s26 + $0x50] sm:$0xff]  ;;  %v220_v31 = vld [vmem:[%s1698_s14 + $0x58] sm:$0xff]  ;;  %p1499_p13 = pnand %p1498_p6, %p1622_p11  ;;  %p1504_p9 = por %p1503_p2, %p1502_p10 }
  0x42   : > { %981 = vst [vmem:[%s1720_s20 + $0x20] sm:$0xff] %v725_v16  ;;  %v476_v32 = vld [vmem:[%s1705_s26 + $0x58] sm:$0xff]  ;;  %v730_v33 = vadd.f32 %v474_v27, %v218_v26  ;;  %v221_v34 = vld [vmem:[%s1698_s14 + $0x60] sm:$0xff]  ;;  %v731_v36 = vadd.f32 %v475_v30, %v219_v28  ;;  %v222_v37 = vld [vmem:[%s1698_s14 + $0x68] sm:$0xff] }
  0x43   : > { %982 = vst [vmem:[%s1720_s20 + $0x28] sm:$0xff] %v726_v17  ;;  %v477_v35 = vld [vmem:[%s1705_s26 + $0x60] sm:$0xff]  ;;  %v478_v38 = vld [vmem:[%s1705_s26 + $0x68] sm:$0xff]  ;;  %v732_v39 = vadd.f32 %v476_v32, %v220_v31  ;;  %v223_v40 = vld [vmem:[%s1698_s14 + $0x70] sm:$0xff]  ;;  %p1500_p3 = pneg %p1499_p13 }
  0x44   : > { %983 = vst [vmem:[%s1720_s20 + $0x30] sm:$0xff] %v727_v21  ;;  %v479_v41 = vld [vmem:[%s1705_s26 + $0x70] sm:$0xff]  ;;  %v733_v42 = vadd.f32 %v477_v35, %v221_v34  ;;  %v224_v43 = vld [vmem:[%s1698_s14 + $0x78] sm:$0xff]  ;;  %v734_v45 = vadd.f32 %v478_v38, %v222_v37  ;;  %v225_v46 = vld [vmem:[%s1698_s14 + $0x80] sm:$0xff] }
  0x45   : > { %984 = vst [vmem:[%s1720_s20 + $0x38] sm:$0xff] %v728_v25  ;;  %v480_v44 = vld [vmem:[%s1705_s26 + $0x78] sm:$0xff]  ;;  %v481_v47 = vld [vmem:[%s1705_s26 + $0x80] sm:$0xff]  ;;  %v735_v48 = vadd.f32 %v479_v41, %v223_v40  ;;  %v226_v49 = vld [vmem:[%s1698_s14 + $0x88] sm:$0xff]  ;;  %p1505_p0 = pnand %p1504_p9, %p1500_p3 }
  0x46   : > { %985 = vst [vmem:[%s1720_s20 + $0x40] sm:$0xff] %v729_v29  ;;  %v482_v50 = vld [vmem:[%s1705_s26 + $0x88] sm:$0xff]  ;;  %v736_v51 = vadd.f32 %v480_v44, %v224_v43  ;;  %v227_v52 = vld [vmem:[%s1698_s14 + $0x90] sm:$0xff]  ;;  %v737_v54 = vadd.f32 %v481_v47, %v225_v46  ;;  %v228_v55 = vld [vmem:[%s1698_s14 + $0x98] sm:$0xff] }
  0x47   : > { %986 = vst [vmem:[%s1720_s20 + $0x48] sm:$0xff] %v730_v33  ;;  %v483_v53 = vld [vmem:[%s1705_s26 + $0x90] sm:$0xff]  ;;  %v484_v56 = vld [vmem:[%s1705_s26 + $0x98] sm:$0xff]  ;;  %v738_v57 = vadd.f32 %v482_v50, %v226_v49  ;;  %v229_v58 = vld [vmem:[%s1698_s14 + $0xa0] sm:$0xff] }
  0x48   : > { %987 = vst [vmem:[%s1720_s20 + $0x50] sm:$0xff] %v731_v36  ;;  %v485_v59 = vld [vmem:[%s1705_s26 + $0xa0] sm:$0xff]  ;;  %v739_v60 = vadd.f32 %v483_v53, %v227_v52  ;;  %v230_v61 = vld [vmem:[%s1698_s14 + $0xa8] sm:$0xff]  ;;  %v740_v63 = vadd.f32 %v484_v56, %v228_v55  ;;  %v231_v0 = vld [vmem:[%s1698_s14 + $0xb0] sm:$0xff] }
  0x49   : > { %988 = vst [vmem:[%s1720_s20 + $0x58] sm:$0xff] %v732_v39  ;;  %v486_v62 = vld [vmem:[%s1705_s26 + $0xa8] sm:$0xff]  ;;  %v487_v1 = vld [vmem:[%s1705_s26 + $0xb0] sm:$0xff]  ;;  %v741_v2 = vadd.f32 %v485_v59, %v229_v58  ;;  %v232_v3 = vld [vmem:[%s1698_s14 + $0xb8] sm:$0xff] }
  0x4a   : > { %989 = vst [vmem:[%s1720_s20 + $0x60] sm:$0xff] %v733_v42  ;;  %v488_v4 = vld [vmem:[%s1705_s26 + $0xb8] sm:$0xff]  ;;  %v742_v5 = vadd.f32 %v486_v62, %v230_v61  ;;  %v233_v6 = vld [vmem:[%s1698_s14 + $0xc0] sm:$0xff]  ;;  %v743_v8 = vadd.f32 %v487_v1, %v231_v0  ;;  %v234_v9 = vld [vmem:[%s1698_s14 + $0xc8] sm:$0xff] }
  0x4b   : > { %990 = vst [vmem:[%s1720_s20 + $0x68] sm:$0xff] %v734_v45  ;;  %v489_v7 = vld [vmem:[%s1705_s26 + $0xc0] sm:$0xff]  ;;  %v490_v10 = vld [vmem:[%s1705_s26 + $0xc8] sm:$0xff]  ;;  %v744_v11 = vadd.f32 %v488_v4, %v232_v3  ;;  %v235_v12 = vld [vmem:[%s1698_s14 + $0xd0] sm:$0xff] }
  0x4c   : > { %991 = vst [vmem:[%s1720_s20 + $0x70] sm:$0xff] %v735_v48  ;;  %v491_v13 = vld [vmem:[%s1705_s26 + $0xd0] sm:$0xff]  ;;  %v745_v14 = vadd.f32 %v489_v7, %v233_v6  ;;  %v236_v15 = vld [vmem:[%s1698_s14 + $0xd8] sm:$0xff]  ;;  %v746_v17 = vadd.f32 %v490_v10, %v234_v9  ;;  %v237_v18 = vld [vmem:[%s1698_s14 + $0xe0] sm:$0xff] }
  0x4d   : > { %992 = vst [vmem:[%s1720_s20 + $0x78] sm:$0xff] %v736_v51  ;;  %v492_v16 = vld [vmem:[%s1705_s26 + $0xd8] sm:$0xff]  ;;  %v493_v19 = vld [vmem:[%s1705_s26 + $0xe0] sm:$0xff]  ;;  %v747_v20 = vadd.f32 %v491_v13, %v235_v12  ;;  %v238_v21 = vld [vmem:[%s1698_s14 + $0xe8] sm:$0xff] }
  0x4e   : > { %993 = vst [vmem:[%s1720_s20 + $0x80] sm:$0xff] %v737_v54  ;;  %v494_v22 = vld [vmem:[%s1705_s26 + $0xe8] sm:$0xff]  ;;  %v748_v23 = vadd.f32 %v492_v16, %v236_v15  ;;  %v239_v24 = vld [vmem:[%s1698_s14 + $0xf0] sm:$0xff]  ;;  %v749_v26 = vadd.f32 %v493_v19, %v237_v18  ;;  %v240_v27 = vld [vmem:[%s1698_s14 + $0xf8] sm:$0xff] }
  0x4f   : > { %994 = vst [vmem:[%s1720_s20 + $0x88] sm:$0xff] %v738_v57  ;;  %v495_v25 = vld [vmem:[%s1705_s26 + $0xf0] sm:$0xff]  ;;  %v496_v28 = vld [vmem:[%s1705_s26 + $0xf8] sm:$0xff]  ;;  %v750_v29 = vadd.f32 %v494_v22, %v238_v21  ;;  %v241_v30 = vld [vmem:[%s1698_s14 + $0x100] sm:$0xff] }
  0x50   : > { %995 = vst [vmem:[%s1720_s20 + $0x90] sm:$0xff] %v739_v60  ;;  %v497_v31 = vld [vmem:[%s1705_s26 + $0x100] sm:$0xff]  ;;  %v751_v32 = vadd.f32 %v495_v25, %v239_v24  ;;  %v242_v33 = vld [vmem:[%s1698_s14 + $0x108] sm:$0xff]  ;;  %v752_v35 = vadd.f32 %v496_v28, %v240_v27  ;;  %v243_v36 = vld [vmem:[%s1698_s14 + $0x110] sm:$0xff] }
  0x51   : > { %996 = vst [vmem:[%s1720_s20 + $0x98] sm:$0xff] %v740_v63  ;;  %v498_v34 = vld [vmem:[%s1705_s26 + $0x108] sm:$0xff]  ;;  %v499_v37 = vld [vmem:[%s1705_s26 + $0x110] sm:$0xff]  ;;  %v753_v38 = vadd.f32 %v497_v31, %v241_v30  ;;  %v244_v39 = vld [vmem:[%s1698_s14 + $0x118] sm:$0xff] }
  0x52   : > { %997 = vst [vmem:[%s1720_s20 + $0xa0] sm:$0xff] %v741_v2  ;;  %v500_v40 = vld [vmem:[%s1705_s26 + $0x118] sm:$0xff]  ;;  %v754_v41 = vadd.f32 %v498_v34, %v242_v33  ;;  %v245_v42 = vld [vmem:[%s1698_s14 + $0x120] sm:$0xff]  ;;  %v755_v44 = vadd.f32 %v499_v37, %v243_v36  ;;  %v246_v45 = vld [vmem:[%s1698_s14 + $0x128] sm:$0xff] }
  0x53   : > { %998 = vst [vmem:[%s1720_s20 + $0xa8] sm:$0xff] %v742_v5  ;;  %v501_v43 = vld [vmem:[%s1705_s26 + $0x120] sm:$0xff]  ;;  %v502_v46 = vld [vmem:[%s1705_s26 + $0x128] sm:$0xff]  ;;  %v756_v47 = vadd.f32 %v500_v40, %v244_v39  ;;  %v247_v48 = vld [vmem:[%s1698_s14 + $0x130] sm:$0xff] }
  0x54   : > { %999 = vst [vmem:[%s1720_s20 + $0xb0] sm:$0xff] %v743_v8  ;;  %v503_v49 = vld [vmem:[%s1705_s26 + $0x130] sm:$0xff]  ;;  %v757_v50 = vadd.f32 %v501_v43, %v245_v42  ;;  %v248_v51 = vld [vmem:[%s1698_s14 + $0x138] sm:$0xff]  ;;  %v758_v53 = vadd.f32 %v502_v46, %v246_v45  ;;  %v249_v54 = vld [vmem:[%s1698_s14 + $0x140] sm:$0xff] }
  0x55   : > { %1000 = vst [vmem:[%s1720_s20 + $0xb8] sm:$0xff] %v744_v11  ;;  %v504_v52 = vld [vmem:[%s1705_s26 + $0x138] sm:$0xff]  ;;  %v505_v55 = vld [vmem:[%s1705_s26 + $0x140] sm:$0xff]  ;;  %v759_v56 = vadd.f32 %v503_v49, %v247_v48  ;;  %v250_v57 = vld [vmem:[%s1698_s14 + $0x148] sm:$0xff] }
  0x56   : > { %1001 = vst [vmem:[%s1720_s20 + $0xc0] sm:$0xff] %v745_v14  ;;  %v506_v58 = vld [vmem:[%s1705_s26 + $0x148] sm:$0xff]  ;;  %v760_v59 = vadd.f32 %v504_v52, %v248_v51  ;;  %v251_v60 = vld [vmem:[%s1698_s14 + $0x150] sm:$0xff]  ;;  %v761_v62 = vadd.f32 %v505_v55, %v249_v54  ;;  %v252_v63 = vld [vmem:[%s1698_s14 + $0x158] sm:$0xff] }
  0x57   : > { %1002 = vst [vmem:[%s1720_s20 + $0xc8] sm:$0xff] %v746_v17  ;;  %v507_v61 = vld [vmem:[%s1705_s26 + $0x150] sm:$0xff]  ;;  %v508_v0 = vld [vmem:[%s1705_s26 + $0x158] sm:$0xff]  ;;  %v762_v1 = vadd.f32 %v506_v58, %v250_v57  ;;  %v253_v2 = vld [vmem:[%s1698_s14 + $0x160] sm:$0xff] }
  0x58   : > { %1003 = vst [vmem:[%s1720_s20 + $0xd0] sm:$0xff] %v747_v20  ;;  %v509_v3 = vld [vmem:[%s1705_s26 + $0x160] sm:$0xff]  ;;  %v763_v4 = vadd.f32 %v507_v61, %v251_v60  ;;  %v254_v5 = vld [vmem:[%s1698_s14 + $0x168] sm:$0xff]  ;;  %v764_v7 = vadd.f32 %v508_v0, %v252_v63  ;;  %v255_v8 = vld [vmem:[%s1698_s14 + $0x170] sm:$0xff] }
  0x59   : > { %1004 = vst [vmem:[%s1720_s20 + $0xd8] sm:$0xff] %v748_v23  ;;  %v510_v6 = vld [vmem:[%s1705_s26 + $0x168] sm:$0xff]  ;;  %v511_v9 = vld [vmem:[%s1705_s26 + $0x170] sm:$0xff]  ;;  %v765_v10 = vadd.f32 %v509_v3, %v253_v2  ;;  %v256_v11 = vld [vmem:[%s1698_s14 + $0x178] sm:$0xff] }
  0x5a   : > { %1005 = vst [vmem:[%s1720_s20 + $0xe0] sm:$0xff] %v749_v26  ;;  %v512_v12 = vld [vmem:[%s1705_s26 + $0x178] sm:$0xff]  ;;  %v766_v13 = vadd.f32 %v510_v6, %v254_v5  ;;  %v257_v14 = vld [vmem:[%s1698_s14 + $0x180] sm:$0xff]  ;;  %v767_v16 = vadd.f32 %v511_v9, %v255_v8  ;;  %v258_v17 = vld [vmem:[%s1698_s14 + $0x188] sm:$0xff] }
  0x5b   : > { %1006 = vst [vmem:[%s1720_s20 + $0xe8] sm:$0xff] %v750_v29  ;;  %v513_v15 = vld [vmem:[%s1705_s26 + $0x180] sm:$0xff]  ;;  %v514_v18 = vld [vmem:[%s1705_s26 + $0x188] sm:$0xff]  ;;  %v768_v19 = vadd.f32 %v512_v12, %v256_v11  ;;  %v259_v20 = vld [vmem:[%s1698_s14 + $0x190] sm:$0xff] }
  0x5c   : > { %1007 = vst [vmem:[%s1720_s20 + $0xf0] sm:$0xff] %v751_v32  ;;  %v515_v21 = vld [vmem:[%s1705_s26 + $0x190] sm:$0xff]  ;;  %v769_v22 = vadd.f32 %v513_v15, %v257_v14  ;;  %v260_v23 = vld [vmem:[%s1698_s14 + $0x198] sm:$0xff]  ;;  %v770_v25 = vadd.f32 %v514_v18, %v258_v17  ;;  %v261_v26 = vld [vmem:[%s1698_s14 + $0x1a0] sm:$0xff] }
  0x5d   : > { %1008 = vst [vmem:[%s1720_s20 + $0xf8] sm:$0xff] %v752_v35  ;;  %v516_v24 = vld [vmem:[%s1705_s26 + $0x198] sm:$0xff]  ;;  %v517_v27 = vld [vmem:[%s1705_s26 + $0x1a0] sm:$0xff]  ;;  %v771_v28 = vadd.f32 %v515_v21, %v259_v20  ;;  %v262_v29 = vld [vmem:[%s1698_s14 + $0x1a8] sm:$0xff] }
  0x5e   : > { %1009 = vst [vmem:[%s1720_s20 + $0x100] sm:$0xff] %v753_v38  ;;  %v518_v30 = vld [vmem:[%s1705_s26 + $0x1a8] sm:$0xff]  ;;  %v772_v31 = vadd.f32 %v516_v24, %v260_v23  ;;  %v263_v32 = vld [vmem:[%s1698_s14 + $0x1b0] sm:$0xff]  ;;  %v773_v34 = vadd.f32 %v517_v27, %v261_v26  ;;  %v264_v35 = vld [vmem:[%s1698_s14 + $0x1b8] sm:$0xff] }
  0x5f   : > { %1010 = vst [vmem:[%s1720_s20 + $0x108] sm:$0xff] %v754_v41  ;;  %v519_v33 = vld [vmem:[%s1705_s26 + $0x1b0] sm:$0xff]  ;;  %v520_v36 = vld [vmem:[%s1705_s26 + $0x1b8] sm:$0xff]  ;;  %v774_v37 = vadd.f32 %v518_v30, %v262_v29  ;;  %v265_v38 = vld [vmem:[%s1698_s14 + $0x1c0] sm:$0xff] }
  0x60   : > { %1011 = vst [vmem:[%s1720_s20 + $0x110] sm:$0xff] %v755_v44  ;;  %v521_v39 = vld [vmem:[%s1705_s26 + $0x1c0] sm:$0xff]  ;;  %v775_v40 = vadd.f32 %v519_v33, %v263_v32  ;;  %v266_v41 = vld [vmem:[%s1698_s14 + $0x1c8] sm:$0xff]  ;;  %v776_v43 = vadd.f32 %v520_v36, %v264_v35  ;;  %v267_v44 = vld [vmem:[%s1698_s14 + $0x1d0] sm:$0xff] }
  0x61   : > { %1012 = vst [vmem:[%s1720_s20 + $0x118] sm:$0xff] %v756_v47  ;;  %v522_v42 = vld [vmem:[%s1705_s26 + $0x1c8] sm:$0xff]  ;;  %v523_v45 = vld [vmem:[%s1705_s26 + $0x1d0] sm:$0xff]  ;;  %v777_v46 = vadd.f32 %v521_v39, %v265_v38  ;;  %v268_v47 = vld [vmem:[%s1698_s14 + $0x1d8] sm:$0xff] }
  0x62   : > { %1013 = vst [vmem:[%s1720_s20 + $0x120] sm:$0xff] %v757_v50  ;;  %v524_v48 = vld [vmem:[%s1705_s26 + $0x1d8] sm:$0xff]  ;;  %v778_v49 = vadd.f32 %v522_v42, %v266_v41  ;;  %v269_v50 = vld [vmem:[%s1698_s14 + $0x1e0] sm:$0xff]  ;;  %v779_v52 = vadd.f32 %v523_v45, %v267_v44  ;;  %v526_v54 = vld [vmem:[%s1705_s26 + $0x1e8] sm:$0xff] }
  0x63   : > { %1014 = vst [vmem:[%s1720_s20 + $0x128] sm:$0xff] %v758_v53  ;;  %v525_v51 = vld [vmem:[%s1705_s26 + $0x1e0] sm:$0xff]  ;;  %v270_v53 = vld [vmem:[%s1698_s14 + $0x1e8] sm:$0xff]  ;;  %v780_v55 = vadd.f32 %v524_v48, %v268_v47  ;;  %v527_v57 = vld [vmem:[%s1705_s26 + $0x1f0] sm:$0xff] }
  0x64   : > { %1015 = vst [vmem:[%s1720_s20 + $0x130] sm:$0xff] %v759_v56  ;;  %v271_v56 = vld [vmem:[%s1698_s14 + $0x1f0] sm:$0xff]  ;;  %v781_v58 = vadd.f32 %v525_v51, %v269_v50  ;;  %v528_v60 = vld [vmem:[%s1705_s26 + $0x1f8] sm:$0xff]  ;;  %v782_v61 = vadd.f32 %v526_v54, %v270_v53  ;;  %v529_v63 = vld [vmem:[%s1705_s26 + $0x200] sm:$0xff] }
  0x65   : > { %1016 = vst [vmem:[%s1720_s20 + $0x138] sm:$0xff] %v760_v59  ;;  %v272_v59 = vld [vmem:[%s1698_s14 + $0x1f8] sm:$0xff]  ;;  %v783_v0 = vadd.f32 %v527_v57, %v271_v56  ;;  %v530_v2 = vld [vmem:[%s1705_s26 + $0x208] sm:$0xff]  ;;  %v531_v5 = vld [vmem:[%s1705_s26 + $0x210] sm:$0xff] }
  0x66   : > { %1017 = vst [vmem:[%s1720_s20 + $0x140] sm:$0xff] %v761_v62  ;;  %v273_v62 = vld [vmem:[%s1698_s14 + $0x200] sm:$0xff]  ;;  %v784_v3 = vadd.f32 %v528_v60, %v272_v59  ;;  %v532_v8 = vld [vmem:[%s1705_s26 + $0x218] sm:$0xff]  ;;  %v534_v14 = vld [vmem:[%s1705_s26 + $0x228] sm:$0xff] }
  0x67   : > { %1018 = vst [vmem:[%s1720_s20 + $0x148] sm:$0xff] %v762_v1  ;;  %v274_v1 = vld [vmem:[%s1698_s14 + $0x208] sm:$0xff]  ;;  %v785_v6 = vadd.f32 %v529_v63, %v273_v62  ;;  %v533_v11 = vld [vmem:[%s1705_s26 + $0x220] sm:$0xff]  ;;  %v535_v17 = vld [vmem:[%s1705_s26 + $0x230] sm:$0xff] }
  0x68   : > { %1019 = vst [vmem:[%s1720_s20 + $0x150] sm:$0xff] %v763_v4  ;;  %v275_v4 = vld [vmem:[%s1698_s14 + $0x210] sm:$0xff]  ;;  %v786_v9 = vadd.f32 %v530_v2, %v274_v1  ;;  %v536_v20 = vld [vmem:[%s1705_s26 + $0x238] sm:$0xff]  ;;  %v537_v23 = vld [vmem:[%s1705_s26 + $0x240] sm:$0xff] }
  0x69   : > { %1020 = vst [vmem:[%s1720_s20 + $0x158] sm:$0xff] %v764_v7  ;;  %v276_v7 = vld [vmem:[%s1698_s14 + $0x218] sm:$0xff]  ;;  %v787_v12 = vadd.f32 %v531_v5, %v275_v4  ;;  %v538_v26 = vld [vmem:[%s1705_s26 + $0x248] sm:$0xff]  ;;  %v539_v29 = vld [vmem:[%s1705_s26 + $0x250] sm:$0xff] }
  0x6a   : > { %1021 = vst [vmem:[%s1720_s20 + $0x160] sm:$0xff] %v765_v10  ;;  %v277_v10 = vld [vmem:[%s1698_s14 + $0x220] sm:$0xff]  ;;  %v788_v15 = vadd.f32 %v532_v8, %v276_v7  ;;  %v540_v32 = vld [vmem:[%s1705_s26 + $0x258] sm:$0xff]  ;;  %v542_v38 = vld [vmem:[%s1705_s26 + $0x268] sm:$0xff] }
  0x6b   : > { %1022 = vst [vmem:[%s1720_s20 + $0x168] sm:$0xff] %v766_v13  ;;  %v278_v13 = vld [vmem:[%s1698_s14 + $0x228] sm:$0xff]  ;;  %v789_v18 = vadd.f32 %v533_v11, %v277_v10  ;;  %v541_v35 = vld [vmem:[%s1705_s26 + $0x260] sm:$0xff]  ;;  %v543_v41 = vld [vmem:[%s1705_s26 + $0x270] sm:$0xff] }
  0x6c   : > { %1023 = vst [vmem:[%s1720_s20 + $0x170] sm:$0xff] %v767_v16  ;;  %v279_v16 = vld [vmem:[%s1698_s14 + $0x230] sm:$0xff]  ;;  %v790_v21 = vadd.f32 %v534_v14, %v278_v13  ;;  %v544_v44 = vld [vmem:[%s1705_s26 + $0x278] sm:$0xff]  ;;  %v545_v47 = vld [vmem:[%s1705_s26 + $0x280] sm:$0xff] }
  0x6d   : > { %1024 = vst [vmem:[%s1720_s20 + $0x178] sm:$0xff] %v768_v19  ;;  %v280_v19 = vld [vmem:[%s1698_s14 + $0x238] sm:$0xff]  ;;  %v791_v24 = vadd.f32 %v535_v17, %v279_v16  ;;  %v546_v50 = vld [vmem:[%s1705_s26 + $0x288] sm:$0xff]  ;;  %v547_v53 = vld [vmem:[%s1705_s26 + $0x290] sm:$0xff] }
  0x6e   : > { %1025 = vst [vmem:[%s1720_s20 + $0x180] sm:$0xff] %v769_v22  ;;  %v281_v22 = vld [vmem:[%s1698_s14 + $0x240] sm:$0xff]  ;;  %v792_v27 = vadd.f32 %v536_v20, %v280_v19  ;;  %v548_v56 = vld [vmem:[%s1705_s26 + $0x298] sm:$0xff]  ;;  %v550_v62 = vld [vmem:[%s1705_s26 + $0x2a8] sm:$0xff] }
  0x6f   : > { %1026 = vst [vmem:[%s1720_s20 + $0x188] sm:$0xff] %v770_v25  ;;  %v282_v25 = vld [vmem:[%s1698_s14 + $0x248] sm:$0xff]  ;;  %v793_v30 = vadd.f32 %v537_v23, %v281_v22  ;;  %v549_v59 = vld [vmem:[%s1705_s26 + $0x2a0] sm:$0xff]  ;;  %v551_v1 = vld [vmem:[%s1705_s26 + $0x2b0] sm:$0xff] }
  0x70   : > { %1027 = vst [vmem:[%s1720_s20 + $0x190] sm:$0xff] %v771_v28  ;;  %v283_v28 = vld [vmem:[%s1698_s14 + $0x250] sm:$0xff]  ;;  %v794_v33 = vadd.f32 %v538_v26, %v282_v25  ;;  %v552_v4 = vld [vmem:[%s1705_s26 + $0x2b8] sm:$0xff]  ;;  %v553_v7 = vld [vmem:[%s1705_s26 + $0x2c0] sm:$0xff] }
  0x71   : > { %1028 = vst [vmem:[%s1720_s20 + $0x198] sm:$0xff] %v772_v31  ;;  %v284_v31 = vld [vmem:[%s1698_s14 + $0x258] sm:$0xff]  ;;  %v795_v36 = vadd.f32 %v539_v29, %v283_v28  ;;  %v554_v10 = vld [vmem:[%s1705_s26 + $0x2c8] sm:$0xff]  ;;  %v555_v13 = vld [vmem:[%s1705_s26 + $0x2d0] sm:$0xff] }
  0x72   : > { %1029 = vst [vmem:[%s1720_s20 + $0x1a0] sm:$0xff] %v773_v34  ;;  %v285_v34 = vld [vmem:[%s1698_s14 + $0x260] sm:$0xff]  ;;  %v796_v39 = vadd.f32 %v540_v32, %v284_v31  ;;  %v556_v16 = vld [vmem:[%s1705_s26 + $0x2d8] sm:$0xff]  ;;  %v558_v22 = vld [vmem:[%s1705_s26 + $0x2e8] sm:$0xff] }
  0x73   : > { %1030 = vst [vmem:[%s1720_s20 + $0x1a8] sm:$0xff] %v774_v37  ;;  %v286_v37 = vld [vmem:[%s1698_s14 + $0x268] sm:$0xff]  ;;  %v797_v42 = vadd.f32 %v541_v35, %v285_v34  ;;  %v557_v19 = vld [vmem:[%s1705_s26 + $0x2e0] sm:$0xff]  ;;  %v559_v25 = vld [vmem:[%s1705_s26 + $0x2f0] sm:$0xff] }
  0x74   : > { %1031 = vst [vmem:[%s1720_s20 + $0x1b0] sm:$0xff] %v775_v40  ;;  %v287_v40 = vld [vmem:[%s1698_s14 + $0x270] sm:$0xff]  ;;  %v798_v45 = vadd.f32 %v542_v38, %v286_v37  ;;  %v560_v28 = vld [vmem:[%s1705_s26 + $0x2f8] sm:$0xff]  ;;  %v561_v31 = vld [vmem:[%s1705_s26 + $0x300] sm:$0xff] }
  0x75   : > { %1032 = vst [vmem:[%s1720_s20 + $0x1b8] sm:$0xff] %v776_v43  ;;  %v288_v43 = vld [vmem:[%s1698_s14 + $0x278] sm:$0xff]  ;;  %v799_v48 = vadd.f32 %v543_v41, %v287_v40  ;;  %v562_v34 = vld [vmem:[%s1705_s26 + $0x308] sm:$0xff]  ;;  %v563_v37 = vld [vmem:[%s1705_s26 + $0x310] sm:$0xff] }
  0x76   : > { %1033 = vst [vmem:[%s1720_s20 + $0x1c0] sm:$0xff] %v777_v46  ;;  %v289_v46 = vld [vmem:[%s1698_s14 + $0x280] sm:$0xff]  ;;  %v800_v51 = vadd.f32 %v544_v44, %v288_v43  ;;  %v564_v40 = vld [vmem:[%s1705_s26 + $0x318] sm:$0xff] }
  0x77   : > { %1034 = vst [vmem:[%s1720_s20 + $0x1c8] sm:$0xff] %v778_v49  ;;  %v290_v49 = vld [vmem:[%s1698_s14 + $0x288] sm:$0xff]  ;;  %v801_v54 = vadd.f32 %v545_v47, %v289_v46  ;;  %v565_v43 = vld [vmem:[%s1705_s26 + $0x320] sm:$0xff] }
  0x78   : > { %1035 = vst [vmem:[%s1720_s20 + $0x1d0] sm:$0xff] %v779_v52  ;;  %v291_v52 = vld [vmem:[%s1698_s14 + $0x290] sm:$0xff]  ;;  %v802_v57 = vadd.f32 %v546_v50, %v290_v49  ;;  %v566_v46 = vld [vmem:[%s1705_s26 + $0x328] sm:$0xff] }
  0x79   : > { %1036 = vst [vmem:[%s1720_s20 + $0x1d8] sm:$0xff] %v780_v55  ;;  %v292_v55 = vld [vmem:[%s1698_s14 + $0x298] sm:$0xff]  ;;  %v803_v60 = vadd.f32 %v547_v53, %v291_v52  ;;  %v567_v49 = vld [vmem:[%s1705_s26 + $0x330] sm:$0xff] }
  0x7a   : > { %1037 = vst [vmem:[%s1720_s20 + $0x1e0] sm:$0xff] %v781_v58  ;;  %v293_v58 = vld [vmem:[%s1698_s14 + $0x2a0] sm:$0xff]  ;;  %v804_v63 = vadd.f32 %v548_v56, %v292_v55  ;;  %v568_v52 = vld [vmem:[%s1705_s26 + $0x338] sm:$0xff] }
  0x7b   : > { %1038 = vst [vmem:[%s1720_s20 + $0x1e8] sm:$0xff] %v782_v61  ;;  %v294_v61 = vld [vmem:[%s1698_s14 + $0x2a8] sm:$0xff]  ;;  %v805_v2 = vadd.f32 %v549_v59, %v293_v58  ;;  %v569_v55 = vld [vmem:[%s1705_s26 + $0x340] sm:$0xff] }
  0x7c   : > { %1039 = vst [vmem:[%s1720_s20 + $0x1f0] sm:$0xff] %v783_v0  ;;  %v295_v0 = vld [vmem:[%s1698_s14 + $0x2b0] sm:$0xff]  ;;  %v806_v5 = vadd.f32 %v550_v62, %v294_v61  ;;  %v570_v58 = vld [vmem:[%s1705_s26 + $0x348] sm:$0xff] }
  0x7d   : > { %1040 = vst [vmem:[%s1720_s20 + $0x1f8] sm:$0xff] %v784_v3  ;;  %v296_v3 = vld [vmem:[%s1698_s14 + $0x2b8] sm:$0xff]  ;;  %v807_v8 = vadd.f32 %v551_v1, %v295_v0  ;;  %v571_v61 = vld [vmem:[%s1705_s26 + $0x350] sm:$0xff] }
  0x7e   : > { %1041 = vst [vmem:[%s1720_s20 + $0x200] sm:$0xff] %v785_v6  ;;  %v297_v6 = vld [vmem:[%s1698_s14 + $0x2c0] sm:$0xff]  ;;  %v808_v11 = vadd.f32 %v552_v4, %v296_v3  ;;  %v572_v0 = vld [vmem:[%s1705_s26 + $0x358] sm:$0xff] }
  0x7f   : > { %1042 = vst [vmem:[%s1720_s20 + $0x208] sm:$0xff] %v786_v9  ;;  %v298_v9 = vld [vmem:[%s1698_s14 + $0x2c8] sm:$0xff]  ;;  %v809_v14 = vadd.f32 %v553_v7, %v297_v6  ;;  %v573_v3 = vld [vmem:[%s1705_s26 + $0x360] sm:$0xff] }
  0x80   : > { %1043 = vst [vmem:[%s1720_s20 + $0x210] sm:$0xff] %v787_v12  ;;  %v299_v12 = vld [vmem:[%s1698_s14 + $0x2d0] sm:$0xff]  ;;  %v810_v17 = vadd.f32 %v554_v10, %v298_v9  ;;  %v574_v6 = vld [vmem:[%s1705_s26 + $0x368] sm:$0xff] }
  0x81   : > { %1044 = vst [vmem:[%s1720_s20 + $0x218] sm:$0xff] %v788_v15  ;;  %v300_v15 = vld [vmem:[%s1698_s14 + $0x2d8] sm:$0xff]  ;;  %v811_v20 = vadd.f32 %v555_v13, %v299_v12  ;;  %v575_v9 = vld [vmem:[%s1705_s26 + $0x370] sm:$0xff] }
  0x82   : > { %1045 = vst [vmem:[%s1720_s20 + $0x220] sm:$0xff] %v789_v18  ;;  %v301_v18 = vld [vmem:[%s1698_s14 + $0x2e0] sm:$0xff]  ;;  %v812_v23 = vadd.f32 %v556_v16, %v300_v15  ;;  %v576_v12 = vld [vmem:[%s1705_s26 + $0x378] sm:$0xff] }
  0x83   : > { %1046 = vst [vmem:[%s1720_s20 + $0x228] sm:$0xff] %v790_v21  ;;  %v302_v21 = vld [vmem:[%s1698_s14 + $0x2e8] sm:$0xff]  ;;  %v813_v26 = vadd.f32 %v557_v19, %v301_v18  ;;  %v577_v15 = vld [vmem:[%s1705_s26 + $0x380] sm:$0xff] }
  0x84   : > { %1047 = vst [vmem:[%s1720_s20 + $0x230] sm:$0xff] %v791_v24  ;;  %v303_v24 = vld [vmem:[%s1698_s14 + $0x2f0] sm:$0xff]  ;;  %v814_v29 = vadd.f32 %v558_v22, %v302_v21  ;;  %v578_v18 = vld [vmem:[%s1705_s26 + $0x388] sm:$0xff] }
  0x85   : > { %1048 = vst [vmem:[%s1720_s20 + $0x238] sm:$0xff] %v792_v27  ;;  %v304_v27 = vld [vmem:[%s1698_s14 + $0x2f8] sm:$0xff]  ;;  %v815_v32 = vadd.f32 %v559_v25, %v303_v24  ;;  %v579_v21 = vld [vmem:[%s1705_s26 + $0x390] sm:$0xff] }
  0x86   : > { %1049 = vst [vmem:[%s1720_s20 + $0x240] sm:$0xff] %v793_v30  ;;  %v305_v30 = vld [vmem:[%s1698_s14 + $0x300] sm:$0xff]  ;;  %v816_v35 = vadd.f32 %v560_v28, %v304_v27  ;;  %v580_v24 = vld [vmem:[%s1705_s26 + $0x398] sm:$0xff] }
  0x87   : > { %1050 = vst [vmem:[%s1720_s20 + $0x248] sm:$0xff] %v794_v33  ;;  %v306_v33 = vld [vmem:[%s1698_s14 + $0x308] sm:$0xff]  ;;  %v817_v38 = vadd.f32 %v561_v31, %v305_v30  ;;  %v581_v27 = vld [vmem:[%s1705_s26 + $0x3a0] sm:$0xff] }
  0x88   : > { %1051 = vst [vmem:[%s1720_s20 + $0x250] sm:$0xff] %v795_v36  ;;  %v307_v36 = vld [vmem:[%s1698_s14 + $0x310] sm:$0xff]  ;;  %v818_v41 = vadd.f32 %v562_v34, %v306_v33  ;;  %v582_v30 = vld [vmem:[%s1705_s26 + $0x3a8] sm:$0xff] }
  0x89   : > { %1052 = vst [vmem:[%s1720_s20 + $0x258] sm:$0xff] %v796_v39  ;;  %v308_v39 = vld [vmem:[%s1698_s14 + $0x318] sm:$0xff]  ;;  %v819_v44 = vadd.f32 %v563_v37, %v307_v36  ;;  %v583_v33 = vld [vmem:[%s1705_s26 + $0x3b0] sm:$0xff] }
  0x8a   : > { %1053 = vst [vmem:[%s1720_s20 + $0x260] sm:$0xff] %v797_v42  ;;  %v309_v42 = vld [vmem:[%s1698_s14 + $0x320] sm:$0xff]  ;;  %v820_v47 = vadd.f32 %v564_v40, %v308_v39  ;;  %v584_v36 = vld [vmem:[%s1705_s26 + $0x3b8] sm:$0xff] }
  0x8b   : > { %1054 = vst [vmem:[%s1720_s20 + $0x268] sm:$0xff] %v798_v45  ;;  %v310_v45 = vld [vmem:[%s1698_s14 + $0x328] sm:$0xff]  ;;  %v821_v50 = vadd.f32 %v565_v43, %v309_v42  ;;  %v585_v39 = vld [vmem:[%s1705_s26 + $0x3c0] sm:$0xff] }
  0x8c   : > { %1055 = vst [vmem:[%s1720_s20 + $0x270] sm:$0xff] %v799_v48  ;;  %v311_v48 = vld [vmem:[%s1698_s14 + $0x330] sm:$0xff]  ;;  %v822_v53 = vadd.f32 %v566_v46, %v310_v45  ;;  %v586_v42 = vld [vmem:[%s1705_s26 + $0x3c8] sm:$0xff] }
  0x8d   : > { %1056 = vst [vmem:[%s1720_s20 + $0x278] sm:$0xff] %v800_v51  ;;  %v312_v51 = vld [vmem:[%s1698_s14 + $0x338] sm:$0xff]  ;;  %v823_v56 = vadd.f32 %v567_v49, %v311_v48  ;;  %v587_v45 = vld [vmem:[%s1705_s26 + $0x3d0] sm:$0xff] }
  0x8e   : > { %1057 = vst [vmem:[%s1720_s20 + $0x280] sm:$0xff] %v801_v54  ;;  %v313_v54 = vld [vmem:[%s1698_s14 + $0x340] sm:$0xff]  ;;  %v824_v59 = vadd.f32 %v568_v52, %v312_v51  ;;  %v588_v48 = vld [vmem:[%s1705_s26 + $0x3d8] sm:$0xff] }
  0x8f   : > { %1058 = vst [vmem:[%s1720_s20 + $0x288] sm:$0xff] %v802_v57  ;;  %v314_v57 = vld [vmem:[%s1698_s14 + $0x348] sm:$0xff]  ;;  %v825_v62 = vadd.f32 %v569_v55, %v313_v54  ;;  %v589_v51 = vld [vmem:[%s1705_s26 + $0x3e0] sm:$0xff] }
  0x90   : > { %1059 = vst [vmem:[%s1720_s20 + $0x290] sm:$0xff] %v803_v60  ;;  %v315_v60 = vld [vmem:[%s1698_s14 + $0x350] sm:$0xff]  ;;  %v826_v1 = vadd.f32 %v570_v58, %v314_v57  ;;  %v590_v54 = vld [vmem:[%s1705_s26 + $0x3e8] sm:$0xff] }
  0x91   : > { %1060 = vst [vmem:[%s1720_s20 + $0x298] sm:$0xff] %v804_v63  ;;  %v316_v63 = vld [vmem:[%s1698_s14 + $0x358] sm:$0xff]  ;;  %v827_v4 = vadd.f32 %v571_v61, %v315_v60  ;;  %v591_v57 = vld [vmem:[%s1705_s26 + $0x3f0] sm:$0xff] }
  0x92   : > { %1061 = vst [vmem:[%s1720_s20 + $0x2a0] sm:$0xff] %v805_v2  ;;  %v317_v2 = vld [vmem:[%s1698_s14 + $0x360] sm:$0xff]  ;;  %v828_v7 = vadd.f32 %v572_v0, %v316_v63  ;;  %v592_v60 = vld [vmem:[%s1705_s26 + $0x3f8] sm:$0xff] }
  0x93   : > { %1062 = vst [vmem:[%s1720_s20 + $0x2a8] sm:$0xff] %v806_v5  ;;  %v318_v5 = vld [vmem:[%s1698_s14 + $0x368] sm:$0xff]  ;;  %v829_v10 = vadd.f32 %v573_v3, %v317_v2  ;;  %v593_v63 = vld [vmem:[%s1705_s26 + $0x400] sm:$0xff] }
  0x94   : > { %1063 = vst [vmem:[%s1720_s20 + $0x2b0] sm:$0xff] %v807_v8  ;;  %v319_v8 = vld [vmem:[%s1698_s14 + $0x370] sm:$0xff]  ;;  %v830_v13 = vadd.f32 %v574_v6, %v318_v5  ;;  %v594_v2 = vld [vmem:[%s1705_s26 + $0x408] sm:$0xff] }
  0x95   : > { %1064 = vst [vmem:[%s1720_s20 + $0x2b8] sm:$0xff] %v808_v11  ;;  %v320_v11 = vld [vmem:[%s1698_s14 + $0x378] sm:$0xff]  ;;  %v831_v16 = vadd.f32 %v575_v9, %v319_v8  ;;  %v595_v5 = vld [vmem:[%s1705_s26 + $0x410] sm:$0xff] }
  0x96   : > { %1065 = vst [vmem:[%s1720_s20 + $0x2c0] sm:$0xff] %v809_v14  ;;  %v321_v14 = vld [vmem:[%s1698_s14 + $0x380] sm:$0xff]  ;;  %v832_v19 = vadd.f32 %v576_v12, %v320_v11  ;;  %v596_v8 = vld [vmem:[%s1705_s26 + $0x418] sm:$0xff] }
  0x97   : > { %1066 = vst [vmem:[%s1720_s20 + $0x2c8] sm:$0xff] %v810_v17  ;;  %v322_v17 = vld [vmem:[%s1698_s14 + $0x388] sm:$0xff]  ;;  %v833_v22 = vadd.f32 %v577_v15, %v321_v14  ;;  %v597_v11 = vld [vmem:[%s1705_s26 + $0x420] sm:$0xff] }
  0x98   : > { %1067 = vst [vmem:[%s1720_s20 + $0x2d0] sm:$0xff] %v811_v20  ;;  %v323_v20 = vld [vmem:[%s1698_s14 + $0x390] sm:$0xff]  ;;  %v834_v25 = vadd.f32 %v578_v18, %v322_v17  ;;  %v598_v14 = vld [vmem:[%s1705_s26 + $0x428] sm:$0xff] }
  0x99   : > { %1068 = vst [vmem:[%s1720_s20 + $0x2d8] sm:$0xff] %v812_v23  ;;  %v324_v23 = vld [vmem:[%s1698_s14 + $0x398] sm:$0xff]  ;;  %v835_v28 = vadd.f32 %v579_v21, %v323_v20  ;;  %v599_v17 = vld [vmem:[%s1705_s26 + $0x430] sm:$0xff] }
  0x9a   : > { %1069 = vst [vmem:[%s1720_s20 + $0x2e0] sm:$0xff] %v813_v26  ;;  %v325_v26 = vld [vmem:[%s1698_s14 + $0x3a0] sm:$0xff]  ;;  %v836_v31 = vadd.f32 %v580_v24, %v324_v23  ;;  %v600_v20 = vld [vmem:[%s1705_s26 + $0x438] sm:$0xff] }
  0x9b   : > { %1070 = vst [vmem:[%s1720_s20 + $0x2e8] sm:$0xff] %v814_v29  ;;  %v326_v29 = vld [vmem:[%s1698_s14 + $0x3a8] sm:$0xff]  ;;  %v837_v34 = vadd.f32 %v581_v27, %v325_v26  ;;  %v601_v23 = vld [vmem:[%s1705_s26 + $0x440] sm:$0xff] }
  0x9c   : > { %1071 = vst [vmem:[%s1720_s20 + $0x2f0] sm:$0xff] %v815_v32  ;;  %v327_v32 = vld [vmem:[%s1698_s14 + $0x3b0] sm:$0xff]  ;;  %v838_v37 = vadd.f32 %v582_v30, %v326_v29  ;;  %v602_v26 = vld [vmem:[%s1705_s26 + $0x448] sm:$0xff] }
  0x9d   : > { %1072 = vst [vmem:[%s1720_s20 + $0x2f8] sm:$0xff] %v816_v35  ;;  %v328_v35 = vld [vmem:[%s1698_s14 + $0x3b8] sm:$0xff]  ;;  %v839_v40 = vadd.f32 %v583_v33, %v327_v32  ;;  %v603_v29 = vld [vmem:[%s1705_s26 + $0x450] sm:$0xff] }
  0x9e   : > { %1073 = vst [vmem:[%s1720_s20 + $0x300] sm:$0xff] %v817_v38  ;;  %v329_v38 = vld [vmem:[%s1698_s14 + $0x3c0] sm:$0xff]  ;;  %v840_v43 = vadd.f32 %v584_v36, %v328_v35  ;;  %v604_v32 = vld [vmem:[%s1705_s26 + $0x458] sm:$0xff] }
  0x9f   : > { %1074 = vst [vmem:[%s1720_s20 + $0x308] sm:$0xff] %v818_v41  ;;  %v330_v41 = vld [vmem:[%s1698_s14 + $0x3c8] sm:$0xff]  ;;  %v841_v46 = vadd.f32 %v585_v39, %v329_v38  ;;  %v605_v35 = vld [vmem:[%s1705_s26 + $0x460] sm:$0xff] }
  0xa0   : > { %1075 = vst [vmem:[%s1720_s20 + $0x310] sm:$0xff] %v819_v44  ;;  %v331_v44 = vld [vmem:[%s1698_s14 + $0x3d0] sm:$0xff]  ;;  %v842_v49 = vadd.f32 %v586_v42, %v330_v41  ;;  %v606_v38 = vld [vmem:[%s1705_s26 + $0x468] sm:$0xff] }
  0xa1   : > { %1076 = vst [vmem:[%s1720_s20 + $0x318] sm:$0xff] %v820_v47  ;;  %v332_v47 = vld [vmem:[%s1698_s14 + $0x3d8] sm:$0xff]  ;;  %v843_v52 = vadd.f32 %v587_v45, %v331_v44  ;;  %v607_v41 = vld [vmem:[%s1705_s26 + $0x470] sm:$0xff] }
  0xa2   : > { %1077 = vst [vmem:[%s1720_s20 + $0x320] sm:$0xff] %v821_v50  ;;  %v333_v50 = vld [vmem:[%s1698_s14 + $0x3e0] sm:$0xff]  ;;  %v844_v55 = vadd.f32 %v588_v48, %v332_v47  ;;  %v608_v44 = vld [vmem:[%s1705_s26 + $0x478] sm:$0xff] }
  0xa3   : > { %1078 = vst [vmem:[%s1720_s20 + $0x328] sm:$0xff] %v822_v53  ;;  %v334_v53 = vld [vmem:[%s1698_s14 + $0x3e8] sm:$0xff]  ;;  %v845_v58 = vadd.f32 %v589_v51, %v333_v50  ;;  %v609_v47 = vld [vmem:[%s1705_s26 + $0x480] sm:$0xff] }
  0xa4   : > { %1079 = vst [vmem:[%s1720_s20 + $0x330] sm:$0xff] %v823_v56  ;;  %v335_v56 = vld [vmem:[%s1698_s14 + $0x3f0] sm:$0xff]  ;;  %v846_v61 = vadd.f32 %v590_v54, %v334_v53  ;;  %v610_v50 = vld [vmem:[%s1705_s26 + $0x488] sm:$0xff] }
  0xa5   : > { %1080 = vst [vmem:[%s1720_s20 + $0x338] sm:$0xff] %v824_v59  ;;  %v336_v59 = vld [vmem:[%s1698_s14 + $0x3f8] sm:$0xff]  ;;  %v847_v0 = vadd.f32 %v591_v57, %v335_v56  ;;  %v611_v53 = vld [vmem:[%s1705_s26 + $0x490] sm:$0xff] }
  0xa6   : > { %1081 = vst [vmem:[%s1720_s20 + $0x340] sm:$0xff] %v825_v62  ;;  %v337_v62 = vld [vmem:[%s1698_s14 + $0x400] sm:$0xff]  ;;  %v848_v3 = vadd.f32 %v592_v60, %v336_v59  ;;  %v612_v56 = vld [vmem:[%s1705_s26 + $0x498] sm:$0xff] }
  0xa7   : > { %1082 = vst [vmem:[%s1720_s20 + $0x348] sm:$0xff] %v826_v1  ;;  %v338_v1 = vld [vmem:[%s1698_s14 + $0x408] sm:$0xff]  ;;  %v849_v6 = vadd.f32 %v593_v63, %v337_v62  ;;  %v613_v59 = vld [vmem:[%s1705_s26 + $0x4a0] sm:$0xff] }
  0xa8   : > { %1083 = vst [vmem:[%s1720_s20 + $0x350] sm:$0xff] %v827_v4  ;;  %v339_v4 = vld [vmem:[%s1698_s14 + $0x410] sm:$0xff]  ;;  %v850_v9 = vadd.f32 %v594_v2, %v338_v1  ;;  %v614_v62 = vld [vmem:[%s1705_s26 + $0x4a8] sm:$0xff] }
  0xa9   : > { %1084 = vst [vmem:[%s1720_s20 + $0x358] sm:$0xff] %v828_v7  ;;  %v340_v7 = vld [vmem:[%s1698_s14 + $0x418] sm:$0xff]  ;;  %v851_v12 = vadd.f32 %v595_v5, %v339_v4  ;;  %v615_v1 = vld [vmem:[%s1705_s26 + $0x4b0] sm:$0xff] }
  0xaa   : > { %1085 = vst [vmem:[%s1720_s20 + $0x360] sm:$0xff] %v829_v10  ;;  %v341_v10 = vld [vmem:[%s1698_s14 + $0x420] sm:$0xff]  ;;  %v852_v15 = vadd.f32 %v596_v8, %v340_v7  ;;  %v616_v4 = vld [vmem:[%s1705_s26 + $0x4b8] sm:$0xff] }
  0xab   : > { %1086 = vst [vmem:[%s1720_s20 + $0x368] sm:$0xff] %v830_v13  ;;  %v342_v13 = vld [vmem:[%s1698_s14 + $0x428] sm:$0xff]  ;;  %v853_v18 = vadd.f32 %v597_v11, %v341_v10  ;;  %v617_v7 = vld [vmem:[%s1705_s26 + $0x4c0] sm:$0xff] }
  0xac   : > { %1087 = vst [vmem:[%s1720_s20 + $0x370] sm:$0xff] %v831_v16  ;;  %v343_v16 = vld [vmem:[%s1698_s14 + $0x430] sm:$0xff]  ;;  %v854_v21 = vadd.f32 %v598_v14, %v342_v13  ;;  %v618_v10 = vld [vmem:[%s1705_s26 + $0x4c8] sm:$0xff] }
  0xad   : > { %1088 = vst [vmem:[%s1720_s20 + $0x378] sm:$0xff] %v832_v19  ;;  %v344_v19 = vld [vmem:[%s1698_s14 + $0x438] sm:$0xff]  ;;  %v855_v24 = vadd.f32 %v599_v17, %v343_v16  ;;  %v619_v13 = vld [vmem:[%s1705_s26 + $0x4d0] sm:$0xff] }
  0xae   : > { %1089 = vst [vmem:[%s1720_s20 + $0x380] sm:$0xff] %v833_v22  ;;  %v345_v22 = vld [vmem:[%s1698_s14 + $0x440] sm:$0xff]  ;;  %v856_v27 = vadd.f32 %v600_v20, %v344_v19  ;;  %v620_v16 = vld [vmem:[%s1705_s26 + $0x4d8] sm:$0xff] }
  0xaf   : > { %1090 = vst [vmem:[%s1720_s20 + $0x388] sm:$0xff] %v834_v25  ;;  %v346_v25 = vld [vmem:[%s1698_s14 + $0x448] sm:$0xff]  ;;  %v857_v30 = vadd.f32 %v601_v23, %v345_v22  ;;  %v621_v19 = vld [vmem:[%s1705_s26 + $0x4e0] sm:$0xff] }
  0xb0   : > { %1091 = vst [vmem:[%s1720_s20 + $0x390] sm:$0xff] %v835_v28  ;;  %v347_v28 = vld [vmem:[%s1698_s14 + $0x450] sm:$0xff]  ;;  %v858_v33 = vadd.f32 %v602_v26, %v346_v25  ;;  %v622_v22 = vld [vmem:[%s1705_s26 + $0x4e8] sm:$0xff] }
  0xb1   : > { %1092 = vst [vmem:[%s1720_s20 + $0x398] sm:$0xff] %v836_v31  ;;  %v348_v31 = vld [vmem:[%s1698_s14 + $0x458] sm:$0xff]  ;;  %v859_v36 = vadd.f32 %v603_v29, %v347_v28  ;;  %v623_v25 = vld [vmem:[%s1705_s26 + $0x4f0] sm:$0xff] }
  0xb2   : > { %1093 = vst [vmem:[%s1720_s20 + $0x3a0] sm:$0xff] %v837_v34  ;;  %v349_v34 = vld [vmem:[%s1698_s14 + $0x460] sm:$0xff]  ;;  %v860_v39 = vadd.f32 %v604_v32, %v348_v31  ;;  %v624_v28 = vld [vmem:[%s1705_s26 + $0x4f8] sm:$0xff] }
  0xb3   : > { %1094 = vst [vmem:[%s1720_s20 + $0x3a8] sm:$0xff] %v838_v37  ;;  %v350_v37 = vld [vmem:[%s1698_s14 + $0x468] sm:$0xff]  ;;  %v861_v42 = vadd.f32 %v605_v35, %v349_v34  ;;  %v625_v31 = vld [vmem:[%s1705_s26 + $0x500] sm:$0xff] }
  0xb4   : > { %1095 = vst [vmem:[%s1720_s20 + $0x3b0] sm:$0xff] %v839_v40  ;;  %v351_v40 = vld [vmem:[%s1698_s14 + $0x470] sm:$0xff]  ;;  %v862_v45 = vadd.f32 %v606_v38, %v350_v37  ;;  %v626_v34 = vld [vmem:[%s1705_s26 + $0x508] sm:$0xff] }
  0xb5   : > { %1096 = vst [vmem:[%s1720_s20 + $0x3b8] sm:$0xff] %v840_v43  ;;  %v352_v43 = vld [vmem:[%s1698_s14 + $0x478] sm:$0xff]  ;;  %v863_v48 = vadd.f32 %v607_v41, %v351_v40  ;;  %v627_v37 = vld [vmem:[%s1705_s26 + $0x510] sm:$0xff] }
  0xb6   : > { %1097 = vst [vmem:[%s1720_s20 + $0x3c0] sm:$0xff] %v841_v46  ;;  %v353_v46 = vld [vmem:[%s1698_s14 + $0x480] sm:$0xff]  ;;  %v864_v51 = vadd.f32 %v608_v44, %v352_v43  ;;  %v628_v40 = vld [vmem:[%s1705_s26 + $0x518] sm:$0xff] }
  0xb7   : > { %1098 = vst [vmem:[%s1720_s20 + $0x3c8] sm:$0xff] %v842_v49  ;;  %v354_v49 = vld [vmem:[%s1698_s14 + $0x488] sm:$0xff]  ;;  %v865_v54 = vadd.f32 %v609_v47, %v353_v46  ;;  %v629_v43 = vld [vmem:[%s1705_s26 + $0x520] sm:$0xff] }
  0xb8   : > { %1099 = vst [vmem:[%s1720_s20 + $0x3d0] sm:$0xff] %v843_v52  ;;  %v355_v52 = vld [vmem:[%s1698_s14 + $0x490] sm:$0xff]  ;;  %v866_v57 = vadd.f32 %v610_v50, %v354_v49  ;;  %v630_v46 = vld [vmem:[%s1705_s26 + $0x528] sm:$0xff] }
  0xb9   : > { %1100 = vst [vmem:[%s1720_s20 + $0x3d8] sm:$0xff] %v844_v55  ;;  %v356_v55 = vld [vmem:[%s1698_s14 + $0x498] sm:$0xff]  ;;  %v867_v60 = vadd.f32 %v611_v53, %v355_v52  ;;  %v631_v49 = vld [vmem:[%s1705_s26 + $0x530] sm:$0xff] }
  0xba   : > { %1101 = vst [vmem:[%s1720_s20 + $0x3e0] sm:$0xff] %v845_v58  ;;  %v357_v58 = vld [vmem:[%s1698_s14 + $0x4a0] sm:$0xff]  ;;  %v868_v63 = vadd.f32 %v612_v56, %v356_v55  ;;  %v632_v52 = vld [vmem:[%s1705_s26 + $0x538] sm:$0xff] }
  0xbb   : > { %1102 = vst [vmem:[%s1720_s20 + $0x3e8] sm:$0xff] %v846_v61  ;;  %v358_v61 = vld [vmem:[%s1698_s14 + $0x4a8] sm:$0xff]  ;;  %v869_v2 = vadd.f32 %v613_v59, %v357_v58  ;;  %v633_v55 = vld [vmem:[%s1705_s26 + $0x540] sm:$0xff] }
  0xbc   : > { %1103 = vst [vmem:[%s1720_s20 + $0x3f0] sm:$0xff] %v847_v0  ;;  %v359_v0 = vld [vmem:[%s1698_s14 + $0x4b0] sm:$0xff]  ;;  %v870_v5 = vadd.f32 %v614_v62, %v358_v61  ;;  %v634_v58 = vld [vmem:[%s1705_s26 + $0x548] sm:$0xff] }
  0xbd   : > { %1104 = vst [vmem:[%s1720_s20 + $0x3f8] sm:$0xff] %v848_v3  ;;  %v360_v3 = vld [vmem:[%s1698_s14 + $0x4b8] sm:$0xff]  ;;  %v871_v8 = vadd.f32 %v615_v1, %v359_v0  ;;  %v635_v61 = vld [vmem:[%s1705_s26 + $0x550] sm:$0xff] }
  0xbe   : > { %1105 = vst [vmem:[%s1720_s20 + $0x400] sm:$0xff] %v849_v6  ;;  %v361_v6 = vld [vmem:[%s1698_s14 + $0x4c0] sm:$0xff]  ;;  %v872_v11 = vadd.f32 %v616_v4, %v360_v3  ;;  %v636_v0 = vld [vmem:[%s1705_s26 + $0x558] sm:$0xff] }
  0xbf   : > { %1106 = vst [vmem:[%s1720_s20 + $0x408] sm:$0xff] %v850_v9  ;;  %v362_v9 = vld [vmem:[%s1698_s14 + $0x4c8] sm:$0xff]  ;;  %v873_v14 = vadd.f32 %v617_v7, %v361_v6  ;;  %v637_v3 = vld [vmem:[%s1705_s26 + $0x560] sm:$0xff] }
  0xc0   : > { %1107 = vst [vmem:[%s1720_s20 + $0x410] sm:$0xff] %v851_v12  ;;  %v363_v12 = vld [vmem:[%s1698_s14 + $0x4d0] sm:$0xff]  ;;  %v874_v17 = vadd.f32 %v618_v10, %v362_v9  ;;  %v638_v6 = vld [vmem:[%s1705_s26 + $0x568] sm:$0xff] }
  0xc1   : > { %1108 = vst [vmem:[%s1720_s20 + $0x418] sm:$0xff] %v852_v15  ;;  %v364_v15 = vld [vmem:[%s1698_s14 + $0x4d8] sm:$0xff]  ;;  %v875_v20 = vadd.f32 %v619_v13, %v363_v12  ;;  %v639_v9 = vld [vmem:[%s1705_s26 + $0x570] sm:$0xff] }
  0xc2   : > { %1109 = vst [vmem:[%s1720_s20 + $0x420] sm:$0xff] %v853_v18  ;;  %v365_v18 = vld [vmem:[%s1698_s14 + $0x4e0] sm:$0xff]  ;;  %v876_v23 = vadd.f32 %v620_v16, %v364_v15  ;;  %v640_v12 = vld [vmem:[%s1705_s26 + $0x578] sm:$0xff] }
  0xc3   : > { %1110 = vst [vmem:[%s1720_s20 + $0x428] sm:$0xff] %v854_v21  ;;  %v366_v21 = vld [vmem:[%s1698_s14 + $0x4e8] sm:$0xff]  ;;  %v877_v26 = vadd.f32 %v621_v19, %v365_v18  ;;  %v641_v15 = vld [vmem:[%s1705_s26 + $0x580] sm:$0xff] }
  0xc4   : > { %1111 = vst [vmem:[%s1720_s20 + $0x430] sm:$0xff] %v855_v24  ;;  %v367_v24 = vld [vmem:[%s1698_s14 + $0x4f0] sm:$0xff]  ;;  %v878_v29 = vadd.f32 %v622_v22, %v366_v21  ;;  %v642_v18 = vld [vmem:[%s1705_s26 + $0x588] sm:$0xff] }
  0xc5   : > { %1112 = vst [vmem:[%s1720_s20 + $0x438] sm:$0xff] %v856_v27  ;;  %v368_v27 = vld [vmem:[%s1698_s14 + $0x4f8] sm:$0xff]  ;;  %v879_v32 = vadd.f32 %v623_v25, %v367_v24  ;;  %v643_v21 = vld [vmem:[%s1705_s26 + $0x590] sm:$0xff] }
  0xc6   : > { %1113 = vst [vmem:[%s1720_s20 + $0x440] sm:$0xff] %v857_v30  ;;  %v369_v30 = vld [vmem:[%s1698_s14 + $0x500] sm:$0xff]  ;;  %v880_v35 = vadd.f32 %v624_v28, %v368_v27  ;;  %v644_v24 = vld [vmem:[%s1705_s26 + $0x598] sm:$0xff] }
  0xc7   : > { %1114 = vst [vmem:[%s1720_s20 + $0x448] sm:$0xff] %v858_v33  ;;  %v370_v33 = vld [vmem:[%s1698_s14 + $0x508] sm:$0xff]  ;;  %v881_v38 = vadd.f32 %v625_v31, %v369_v30  ;;  %v645_v27 = vld [vmem:[%s1705_s26 + $0x5a0] sm:$0xff] }
  0xc8   : > { %1115 = vst [vmem:[%s1720_s20 + $0x450] sm:$0xff] %v859_v36  ;;  %v371_v36 = vld [vmem:[%s1698_s14 + $0x510] sm:$0xff]  ;;  %v882_v41 = vadd.f32 %v626_v34, %v370_v33  ;;  %v646_v30 = vld [vmem:[%s1705_s26 + $0x5a8] sm:$0xff] }
  0xc9   : > { %1116 = vst [vmem:[%s1720_s20 + $0x458] sm:$0xff] %v860_v39  ;;  %v372_v39 = vld [vmem:[%s1698_s14 + $0x518] sm:$0xff]  ;;  %v883_v44 = vadd.f32 %v627_v37, %v371_v36  ;;  %v647_v33 = vld [vmem:[%s1705_s26 + $0x5b0] sm:$0xff] }
  0xca   : > { %1117 = vst [vmem:[%s1720_s20 + $0x460] sm:$0xff] %v861_v42  ;;  %v373_v42 = vld [vmem:[%s1698_s14 + $0x520] sm:$0xff]  ;;  %v884_v47 = vadd.f32 %v628_v40, %v372_v39  ;;  %v648_v36 = vld [vmem:[%s1705_s26 + $0x5b8] sm:$0xff] }
  0xcb   : > { %1118 = vst [vmem:[%s1720_s20 + $0x468] sm:$0xff] %v862_v45  ;;  %v374_v45 = vld [vmem:[%s1698_s14 + $0x528] sm:$0xff]  ;;  %v885_v50 = vadd.f32 %v629_v43, %v373_v42  ;;  %v649_v39 = vld [vmem:[%s1705_s26 + $0x5c0] sm:$0xff] }
  0xcc   : > { %1119 = vst [vmem:[%s1720_s20 + $0x470] sm:$0xff] %v863_v48  ;;  %v375_v48 = vld [vmem:[%s1698_s14 + $0x530] sm:$0xff]  ;;  %v886_v53 = vadd.f32 %v630_v46, %v374_v45  ;;  %v650_v42 = vld [vmem:[%s1705_s26 + $0x5c8] sm:$0xff] }
  0xcd   : > { %1120 = vst [vmem:[%s1720_s20 + $0x478] sm:$0xff] %v864_v51  ;;  %v376_v51 = vld [vmem:[%s1698_s14 + $0x538] sm:$0xff]  ;;  %v887_v56 = vadd.f32 %v631_v49, %v375_v48  ;;  %v651_v45 = vld [vmem:[%s1705_s26 + $0x5d0] sm:$0xff] }
  0xce   : > { %1121 = vst [vmem:[%s1720_s20 + $0x480] sm:$0xff] %v865_v54  ;;  %v377_v54 = vld [vmem:[%s1698_s14 + $0x540] sm:$0xff]  ;;  %v888_v59 = vadd.f32 %v632_v52, %v376_v51  ;;  %v652_v48 = vld [vmem:[%s1705_s26 + $0x5d8] sm:$0xff] }
  0xcf   : > { %1122 = vst [vmem:[%s1720_s20 + $0x488] sm:$0xff] %v866_v57  ;;  %v378_v57 = vld [vmem:[%s1698_s14 + $0x548] sm:$0xff]  ;;  %v889_v62 = vadd.f32 %v633_v55, %v377_v54  ;;  %v653_v51 = vld [vmem:[%s1705_s26 + $0x5e0] sm:$0xff] }
  0xd0   : > { %1123 = vst [vmem:[%s1720_s20 + $0x490] sm:$0xff] %v867_v60  ;;  %v379_v60 = vld [vmem:[%s1698_s14 + $0x550] sm:$0xff]  ;;  %v890_v1 = vadd.f32 %v634_v58, %v378_v57  ;;  %v654_v54 = vld [vmem:[%s1705_s26 + $0x5e8] sm:$0xff] }
  0xd1   : > { %1124 = vst [vmem:[%s1720_s20 + $0x498] sm:$0xff] %v868_v63  ;;  %v380_v63 = vld [vmem:[%s1698_s14 + $0x558] sm:$0xff]  ;;  %v891_v4 = vadd.f32 %v635_v61, %v379_v60  ;;  %v655_v57 = vld [vmem:[%s1705_s26 + $0x5f0] sm:$0xff] }
  0xd2   : > { %1125 = vst [vmem:[%s1720_s20 + $0x4a0] sm:$0xff] %v869_v2  ;;  %v381_v2 = vld [vmem:[%s1698_s14 + $0x560] sm:$0xff]  ;;  %v892_v7 = vadd.f32 %v636_v0, %v380_v63  ;;  %v656_v60 = vld [vmem:[%s1705_s26 + $0x5f8] sm:$0xff] }
  0xd3   : > { %1126 = vst [vmem:[%s1720_s20 + $0x4a8] sm:$0xff] %v870_v5  ;;  %v382_v5 = vld [vmem:[%s1698_s14 + $0x568] sm:$0xff]  ;;  %v893_v10 = vadd.f32 %v637_v3, %v381_v2  ;;  %v657_v63 = vld [vmem:[%s1705_s26 + $0x600] sm:$0xff] }
  0xd4   : > { %1127 = vst [vmem:[%s1720_s20 + $0x4b0] sm:$0xff] %v871_v8  ;;  %v383_v8 = vld [vmem:[%s1698_s14 + $0x570] sm:$0xff]  ;;  %v894_v13 = vadd.f32 %v638_v6, %v382_v5  ;;  %v658_v2 = vld [vmem:[%s1705_s26 + $0x608] sm:$0xff] }
  0xd5   : > { %1128 = vst [vmem:[%s1720_s20 + $0x4b8] sm:$0xff] %v872_v11  ;;  %v384_v11 = vld [vmem:[%s1698_s14 + $0x578] sm:$0xff]  ;;  %v895_v16 = vadd.f32 %v639_v9, %v383_v8  ;;  %v659_v5 = vld [vmem:[%s1705_s26 + $0x610] sm:$0xff] }
  0xd6   : > { %1129 = vst [vmem:[%s1720_s20 + $0x4c0] sm:$0xff] %v873_v14  ;;  %v385_v14 = vld [vmem:[%s1698_s14 + $0x580] sm:$0xff]  ;;  %v896_v19 = vadd.f32 %v640_v12, %v384_v11  ;;  %v660_v8 = vld [vmem:[%s1705_s26 + $0x618] sm:$0xff] }
  0xd7   : > { %1130 = vst [vmem:[%s1720_s20 + $0x4c8] sm:$0xff] %v874_v17  ;;  %v386_v17 = vld [vmem:[%s1698_s14 + $0x588] sm:$0xff]  ;;  %v897_v22 = vadd.f32 %v641_v15, %v385_v14  ;;  %v661_v11 = vld [vmem:[%s1705_s26 + $0x620] sm:$0xff] }
  0xd8   : > { %1131 = vst [vmem:[%s1720_s20 + $0x4d0] sm:$0xff] %v875_v20  ;;  %v387_v20 = vld [vmem:[%s1698_s14 + $0x590] sm:$0xff]  ;;  %v898_v25 = vadd.f32 %v642_v18, %v386_v17  ;;  %v662_v14 = vld [vmem:[%s1705_s26 + $0x628] sm:$0xff] }
  0xd9   : > { %1132 = vst [vmem:[%s1720_s20 + $0x4d8] sm:$0xff] %v876_v23  ;;  %v388_v23 = vld [vmem:[%s1698_s14 + $0x598] sm:$0xff]  ;;  %v899_v28 = vadd.f32 %v643_v21, %v387_v20  ;;  %v663_v17 = vld [vmem:[%s1705_s26 + $0x630] sm:$0xff] }
  0xda   : > { %1133 = vst [vmem:[%s1720_s20 + $0x4e0] sm:$0xff] %v877_v26  ;;  %v389_v26 = vld [vmem:[%s1698_s14 + $0x5a0] sm:$0xff]  ;;  %v900_v31 = vadd.f32 %v644_v24, %v388_v23  ;;  %v664_v20 = vld [vmem:[%s1705_s26 + $0x638] sm:$0xff] }
  0xdb   : > { %1134 = vst [vmem:[%s1720_s20 + $0x4e8] sm:$0xff] %v878_v29  ;;  %v390_v29 = vld [vmem:[%s1698_s14 + $0x5a8] sm:$0xff]  ;;  %v901_v34 = vadd.f32 %v645_v27, %v389_v26  ;;  %v665_v23 = vld [vmem:[%s1705_s26 + $0x640] sm:$0xff] }
  0xdc   : > { %1135 = vst [vmem:[%s1720_s20 + $0x4f0] sm:$0xff] %v879_v32  ;;  %v391_v32 = vld [vmem:[%s1698_s14 + $0x5b0] sm:$0xff]  ;;  %v902_v37 = vadd.f32 %v646_v30, %v390_v29  ;;  %v666_v26 = vld [vmem:[%s1705_s26 + $0x648] sm:$0xff] }
  0xdd   : > { %1136 = vst [vmem:[%s1720_s20 + $0x4f8] sm:$0xff] %v880_v35  ;;  %v392_v35 = vld [vmem:[%s1698_s14 + $0x5b8] sm:$0xff]  ;;  %v903_v40 = vadd.f32 %v647_v33, %v391_v32  ;;  %v667_v29 = vld [vmem:[%s1705_s26 + $0x650] sm:$0xff] }
  0xde   : > { %1137 = vst [vmem:[%s1720_s20 + $0x500] sm:$0xff] %v881_v38  ;;  %v393_v38 = vld [vmem:[%s1698_s14 + $0x5c0] sm:$0xff]  ;;  %v904_v43 = vadd.f32 %v648_v36, %v392_v35  ;;  %v668_v32 = vld [vmem:[%s1705_s26 + $0x658] sm:$0xff] }
  0xdf   : > { %1138 = vst [vmem:[%s1720_s20 + $0x508] sm:$0xff] %v882_v41  ;;  %v394_v41 = vld [vmem:[%s1698_s14 + $0x5c8] sm:$0xff]  ;;  %v905_v46 = vadd.f32 %v649_v39, %v393_v38  ;;  %v669_v35 = vld [vmem:[%s1705_s26 + $0x660] sm:$0xff] }
  0xe0   : > { %1139 = vst [vmem:[%s1720_s20 + $0x510] sm:$0xff] %v883_v44  ;;  %v395_v44 = vld [vmem:[%s1698_s14 + $0x5d0] sm:$0xff]  ;;  %v906_v49 = vadd.f32 %v650_v42, %v394_v41  ;;  %v670_v38 = vld [vmem:[%s1705_s26 + $0x668] sm:$0xff] }
  0xe1   : > { %1140 = vst [vmem:[%s1720_s20 + $0x518] sm:$0xff] %v884_v47  ;;  %v396_v47 = vld [vmem:[%s1698_s14 + $0x5d8] sm:$0xff]  ;;  %v907_v52 = vadd.f32 %v651_v45, %v395_v44  ;;  %v671_v41 = vld [vmem:[%s1705_s26 + $0x670] sm:$0xff] }
  0xe2   : > { %1141 = vst [vmem:[%s1720_s20 + $0x520] sm:$0xff] %v885_v50  ;;  %v397_v50 = vld [vmem:[%s1698_s14 + $0x5e0] sm:$0xff]  ;;  %v908_v55 = vadd.f32 %v652_v48, %v396_v47  ;;  %v672_v44 = vld [vmem:[%s1705_s26 + $0x678] sm:$0xff] }
  0xe3   : > { %1142 = vst [vmem:[%s1720_s20 + $0x528] sm:$0xff] %v886_v53  ;;  %v398_v53 = vld [vmem:[%s1698_s14 + $0x5e8] sm:$0xff]  ;;  %v909_v58 = vadd.f32 %v653_v51, %v397_v50  ;;  %v673_v47 = vld [vmem:[%s1705_s26 + $0x680] sm:$0xff] }
  0xe4   : > { %1143 = vst [vmem:[%s1720_s20 + $0x530] sm:$0xff] %v887_v56  ;;  %v399_v56 = vld [vmem:[%s1698_s14 + $0x5f0] sm:$0xff]  ;;  %v910_v61 = vadd.f32 %v654_v54, %v398_v53  ;;  %v674_v50 = vld [vmem:[%s1705_s26 + $0x688] sm:$0xff] }
  0xe5   : > { %1144 = vst [vmem:[%s1720_s20 + $0x538] sm:$0xff] %v888_v59  ;;  %v400_v59 = vld [vmem:[%s1698_s14 + $0x5f8] sm:$0xff]  ;;  %v911_v0 = vadd.f32 %v655_v57, %v399_v56  ;;  %v675_v53 = vld [vmem:[%s1705_s26 + $0x690] sm:$0xff] }
  0xe6   : > { %1145 = vst [vmem:[%s1720_s20 + $0x540] sm:$0xff] %v889_v62  ;;  %v401_v62 = vld [vmem:[%s1698_s14 + $0x600] sm:$0xff]  ;;  %v912_v3 = vadd.f32 %v656_v60, %v400_v59  ;;  %v676_v56 = vld [vmem:[%s1705_s26 + $0x698] sm:$0xff] }
  0xe7   : > { %1146 = vst [vmem:[%s1720_s20 + $0x548] sm:$0xff] %v890_v1  ;;  %v402_v1 = vld [vmem:[%s1698_s14 + $0x608] sm:$0xff]  ;;  %v913_v6 = vadd.f32 %v657_v63, %v401_v62  ;;  %v677_v59 = vld [vmem:[%s1705_s26 + $0x6a0] sm:$0xff] }
  0xe8   : > { %1147 = vst [vmem:[%s1720_s20 + $0x550] sm:$0xff] %v891_v4  ;;  %v403_v4 = vld [vmem:[%s1698_s14 + $0x610] sm:$0xff]  ;;  %v914_v9 = vadd.f32 %v658_v2, %v402_v1  ;;  %v678_v62 = vld [vmem:[%s1705_s26 + $0x6a8] sm:$0xff] }
  0xe9   : > { %1148 = vst [vmem:[%s1720_s20 + $0x558] sm:$0xff] %v892_v7  ;;  %v404_v7 = vld [vmem:[%s1698_s14 + $0x618] sm:$0xff]  ;;  %v915_v12 = vadd.f32 %v659_v5, %v403_v4  ;;  %v679_v1 = vld [vmem:[%s1705_s26 + $0x6b0] sm:$0xff] }
  0xea   : > { %1149 = vst [vmem:[%s1720_s20 + $0x560] sm:$0xff] %v893_v10  ;;  %v405_v10 = vld [vmem:[%s1698_s14 + $0x620] sm:$0xff]  ;;  %v916_v15 = vadd.f32 %v660_v8, %v404_v7  ;;  %v680_v4 = vld [vmem:[%s1705_s26 + $0x6b8] sm:$0xff] }
  0xeb   : > { %1150 = vst [vmem:[%s1720_s20 + $0x568] sm:$0xff] %v894_v13  ;;  %v406_v13 = vld [vmem:[%s1698_s14 + $0x628] sm:$0xff]  ;;  %v917_v18 = vadd.f32 %v661_v11, %v405_v10  ;;  %v681_v7 = vld [vmem:[%s1705_s26 + $0x6c0] sm:$0xff] }
  0xec   : > { %1151 = vst [vmem:[%s1720_s20 + $0x570] sm:$0xff] %v895_v16  ;;  %v407_v16 = vld [vmem:[%s1698_s14 + $0x630] sm:$0xff]  ;;  %v918_v21 = vadd.f32 %v662_v14, %v406_v13  ;;  %v682_v10 = vld [vmem:[%s1705_s26 + $0x6c8] sm:$0xff] }
  0xed   : > { %1152 = vst [vmem:[%s1720_s20 + $0x578] sm:$0xff] %v896_v19  ;;  %v408_v19 = vld [vmem:[%s1698_s14 + $0x638] sm:$0xff]  ;;  %v919_v24 = vadd.f32 %v663_v17, %v407_v16  ;;  %v683_v13 = vld [vmem:[%s1705_s26 + $0x6d0] sm:$0xff] }
  0xee   : > { %1153 = vst [vmem:[%s1720_s20 + $0x580] sm:$0xff] %v897_v22  ;;  %v409_v22 = vld [vmem:[%s1698_s14 + $0x640] sm:$0xff]  ;;  %v920_v27 = vadd.f32 %v664_v20, %v408_v19  ;;  %v684_v16 = vld [vmem:[%s1705_s26 + $0x6d8] sm:$0xff] }
  0xef   : > { %1154 = vst [vmem:[%s1720_s20 + $0x588] sm:$0xff] %v898_v25  ;;  %v410_v25 = vld [vmem:[%s1698_s14 + $0x648] sm:$0xff]  ;;  %v921_v30 = vadd.f32 %v665_v23, %v409_v22  ;;  %v685_v19 = vld [vmem:[%s1705_s26 + $0x6e0] sm:$0xff] }
  0xf0   : > { %1155 = vst [vmem:[%s1720_s20 + $0x590] sm:$0xff] %v899_v28  ;;  %v411_v28 = vld [vmem:[%s1698_s14 + $0x650] sm:$0xff]  ;;  %v922_v33 = vadd.f32 %v666_v26, %v410_v25  ;;  %v686_v22 = vld [vmem:[%s1705_s26 + $0x6e8] sm:$0xff] }
  0xf1   : > { %1156 = vst [vmem:[%s1720_s20 + $0x598] sm:$0xff] %v900_v31  ;;  %v412_v31 = vld [vmem:[%s1698_s14 + $0x658] sm:$0xff]  ;;  %v923_v36 = vadd.f32 %v667_v29, %v411_v28  ;;  %v687_v25 = vld [vmem:[%s1705_s26 + $0x6f0] sm:$0xff] }
  0xf2   : > { %1157 = vst [vmem:[%s1720_s20 + $0x5a0] sm:$0xff] %v901_v34  ;;  %v413_v34 = vld [vmem:[%s1698_s14 + $0x660] sm:$0xff]  ;;  %v924_v39 = vadd.f32 %v668_v32, %v412_v31  ;;  %v688_v28 = vld [vmem:[%s1705_s26 + $0x6f8] sm:$0xff] }
  0xf3   : > { %1158 = vst [vmem:[%s1720_s20 + $0x5a8] sm:$0xff] %v902_v37  ;;  %v414_v37 = vld [vmem:[%s1698_s14 + $0x668] sm:$0xff]  ;;  %v925_v42 = vadd.f32 %v669_v35, %v413_v34  ;;  %v689_v31 = vld [vmem:[%s1705_s26 + $0x700] sm:$0xff] }
  0xf4   : > { %1159 = vst [vmem:[%s1720_s20 + $0x5b0] sm:$0xff] %v903_v40  ;;  %v415_v40 = vld [vmem:[%s1698_s14 + $0x670] sm:$0xff]  ;;  %v926_v45 = vadd.f32 %v670_v38, %v414_v37  ;;  %v690_v34 = vld [vmem:[%s1705_s26 + $0x708] sm:$0xff] }
  0xf5   : > { %1160 = vst [vmem:[%s1720_s20 + $0x5b8] sm:$0xff] %v904_v43  ;;  %v416_v43 = vld [vmem:[%s1698_s14 + $0x678] sm:$0xff]  ;;  %v927_v48 = vadd.f32 %v671_v41, %v415_v40  ;;  %v691_v37 = vld [vmem:[%s1705_s26 + $0x710] sm:$0xff] }
  0xf6   : > { %1161 = vst [vmem:[%s1720_s20 + $0x5c0] sm:$0xff] %v905_v46  ;;  %v417_v46 = vld [vmem:[%s1698_s14 + $0x680] sm:$0xff]  ;;  %v928_v51 = vadd.f32 %v672_v44, %v416_v43  ;;  %v692_v40 = vld [vmem:[%s1705_s26 + $0x718] sm:$0xff] }
  0xf7   : > { %1162 = vst [vmem:[%s1720_s20 + $0x5c8] sm:$0xff] %v906_v49  ;;  %v418_v49 = vld [vmem:[%s1698_s14 + $0x688] sm:$0xff]  ;;  %v929_v54 = vadd.f32 %v673_v47, %v417_v46  ;;  %v693_v43 = vld [vmem:[%s1705_s26 + $0x720] sm:$0xff] }
  0xf8   : > { %1163 = vst [vmem:[%s1720_s20 + $0x5d0] sm:$0xff] %v907_v52  ;;  %v419_v52 = vld [vmem:[%s1698_s14 + $0x690] sm:$0xff]  ;;  %v930_v57 = vadd.f32 %v674_v50, %v418_v49  ;;  %v694_v46 = vld [vmem:[%s1705_s26 + $0x728] sm:$0xff] }
  0xf9   : > { %1164 = vst [vmem:[%s1720_s20 + $0x5d8] sm:$0xff] %v908_v55  ;;  %v420_v55 = vld [vmem:[%s1698_s14 + $0x698] sm:$0xff]  ;;  %v931_v60 = vadd.f32 %v675_v53, %v419_v52  ;;  %v695_v49 = vld [vmem:[%s1705_s26 + $0x730] sm:$0xff] }
  0xfa   : > { %1165 = vst [vmem:[%s1720_s20 + $0x5e0] sm:$0xff] %v909_v58  ;;  %v421_v58 = vld [vmem:[%s1698_s14 + $0x6a0] sm:$0xff]  ;;  %v932_v63 = vadd.f32 %v676_v56, %v420_v55  ;;  %v696_v52 = vld [vmem:[%s1705_s26 + $0x738] sm:$0xff] }
  0xfb   : > { %1166 = vst [vmem:[%s1720_s20 + $0x5e8] sm:$0xff] %v910_v61  ;;  %v422_v61 = vld [vmem:[%s1698_s14 + $0x6a8] sm:$0xff]  ;;  %v933_v2 = vadd.f32 %v677_v59, %v421_v58  ;;  %v697_v55 = vld [vmem:[%s1705_s26 + $0x740] sm:$0xff] }
  0xfc   : > { %1167 = vst [vmem:[%s1720_s20 + $0x5f0] sm:$0xff] %v911_v0  ;;  %v423_v0 = vld [vmem:[%s1698_s14 + $0x6b0] sm:$0xff]  ;;  %v934_v5 = vadd.f32 %v678_v62, %v422_v61  ;;  %v698_v58 = vld [vmem:[%s1705_s26 + $0x748] sm:$0xff] }
  0xfd   : > { %1168 = vst [vmem:[%s1720_s20 + $0x5f8] sm:$0xff] %v912_v3  ;;  %v424_v3 = vld [vmem:[%s1698_s14 + $0x6b8] sm:$0xff]  ;;  %v935_v8 = vadd.f32 %v679_v1, %v423_v0  ;;  %v699_v61 = vld [vmem:[%s1705_s26 + $0x750] sm:$0xff] }
  0xfe   : > { %1169 = vst [vmem:[%s1720_s20 + $0x600] sm:$0xff] %v913_v6  ;;  %v425_v6 = vld [vmem:[%s1698_s14 + $0x6c0] sm:$0xff]  ;;  %v936_v11 = vadd.f32 %v680_v4, %v424_v3  ;;  %v700_v0 = vld [vmem:[%s1705_s26 + $0x758] sm:$0xff] }
  0xff   : > { %1170 = vst [vmem:[%s1720_s20 + $0x608] sm:$0xff] %v914_v9  ;;  %v426_v9 = vld [vmem:[%s1698_s14 + $0x6c8] sm:$0xff]  ;;  %v937_v14 = vadd.f32 %v681_v7, %v425_v6  ;;  %v701_v3 = vld [vmem:[%s1705_s26 + $0x760] sm:$0xff] }
 0x100   : > { %1171 = vst [vmem:[%s1720_s20 + $0x610] sm:$0xff] %v915_v12  ;;  %v427_v12 = vld [vmem:[%s1698_s14 + $0x6d0] sm:$0xff]  ;;  %v938_v17 = vadd.f32 %v682_v10, %v426_v9  ;;  %v702_v6 = vld [vmem:[%s1705_s26 + $0x768] sm:$0xff] }
 0x101   : > { %1172 = vst [vmem:[%s1720_s20 + $0x618] sm:$0xff] %v916_v15  ;;  %v428_v15 = vld [vmem:[%s1698_s14 + $0x6d8] sm:$0xff]  ;;  %v939_v20 = vadd.f32 %v683_v13, %v427_v12  ;;  %v703_v9 = vld [vmem:[%s1705_s26 + $0x770] sm:$0xff] }
 0x102   : > { %1173 = vst [vmem:[%s1720_s20 + $0x620] sm:$0xff] %v917_v18  ;;  %v429_v18 = vld [vmem:[%s1698_s14 + $0x6e0] sm:$0xff]  ;;  %v940_v23 = vadd.f32 %v684_v16, %v428_v15  ;;  %v704_v12 = vld [vmem:[%s1705_s26 + $0x778] sm:$0xff] }
 0x103   : > { %1174 = vst [vmem:[%s1720_s20 + $0x628] sm:$0xff] %v918_v21  ;;  %v430_v21 = vld [vmem:[%s1698_s14 + $0x6e8] sm:$0xff]  ;;  %v941_v26 = vadd.f32 %v685_v19, %v429_v18  ;;  %v705_v15 = vld [vmem:[%s1705_s26 + $0x780] sm:$0xff] }
 0x104   : > { %1175 = vst [vmem:[%s1720_s20 + $0x630] sm:$0xff] %v919_v24  ;;  %v431_v24 = vld [vmem:[%s1698_s14 + $0x6f0] sm:$0xff]  ;;  %v942_v29 = vadd.f32 %v686_v22, %v430_v21  ;;  %v706_v18 = vld [vmem:[%s1705_s26 + $0x788] sm:$0xff] }
 0x105   : > { %1176 = vst [vmem:[%s1720_s20 + $0x638] sm:$0xff] %v920_v27  ;;  %v432_v27 = vld [vmem:[%s1698_s14 + $0x6f8] sm:$0xff]  ;;  %v943_v32 = vadd.f32 %v687_v25, %v431_v24  ;;  %v707_v21 = vld [vmem:[%s1705_s26 + $0x790] sm:$0xff] }
 0x106   : > { %1177 = vst [vmem:[%s1720_s20 + $0x640] sm:$0xff] %v921_v30  ;;  %v433_v30 = vld [vmem:[%s1698_s14 + $0x700] sm:$0xff]  ;;  %v944_v35 = vadd.f32 %v688_v28, %v432_v27  ;;  %v708_v24 = vld [vmem:[%s1705_s26 + $0x798] sm:$0xff] }
 0x107   : > { %1178 = vst [vmem:[%s1720_s20 + $0x648] sm:$0xff] %v922_v33  ;;  %v434_v33 = vld [vmem:[%s1698_s14 + $0x708] sm:$0xff]  ;;  %v945_v38 = vadd.f32 %v689_v31, %v433_v30  ;;  %v709_v27 = vld [vmem:[%s1705_s26 + $0x7a0] sm:$0xff] }
 0x108   : > { %1179 = vst [vmem:[%s1720_s20 + $0x650] sm:$0xff] %v923_v36  ;;  %v435_v36 = vld [vmem:[%s1698_s14 + $0x710] sm:$0xff]  ;;  %v946_v41 = vadd.f32 %v690_v34, %v434_v33  ;;  %v710_v30 = vld [vmem:[%s1705_s26 + $0x7a8] sm:$0xff] }
 0x109   : > { %1180 = vst [vmem:[%s1720_s20 + $0x658] sm:$0xff] %v924_v39  ;;  %v436_v39 = vld [vmem:[%s1698_s14 + $0x718] sm:$0xff]  ;;  %v947_v44 = vadd.f32 %v691_v37, %v435_v36  ;;  %v711_v33 = vld [vmem:[%s1705_s26 + $0x7b0] sm:$0xff] }
 0x10a   : > { %1181 = vst [vmem:[%s1720_s20 + $0x660] sm:$0xff] %v925_v42  ;;  %v437_v42 = vld [vmem:[%s1698_s14 + $0x720] sm:$0xff]  ;;  %v948_v47 = vadd.f32 %v692_v40, %v436_v39  ;;  %v712_v36 = vld [vmem:[%s1705_s26 + $0x7b8] sm:$0xff] }
 0x10b   : > { %1182 = vst [vmem:[%s1720_s20 + $0x668] sm:$0xff] %v926_v45  ;;  %v438_v45 = vld [vmem:[%s1698_s14 + $0x728] sm:$0xff]  ;;  %v949_v50 = vadd.f32 %v693_v43, %v437_v42  ;;  %v713_v39 = vld [vmem:[%s1705_s26 + $0x7c0] sm:$0xff] }
 0x10c   : > { %1183 = vst [vmem:[%s1720_s20 + $0x670] sm:$0xff] %v927_v48  ;;  %v439_v48 = vld [vmem:[%s1698_s14 + $0x730] sm:$0xff]  ;;  %v950_v53 = vadd.f32 %v694_v46, %v438_v45  ;;  %v714_v42 = vld [vmem:[%s1705_s26 + $0x7c8] sm:$0xff] }
 0x10d   : > { %1184 = vst [vmem:[%s1720_s20 + $0x678] sm:$0xff] %v928_v51  ;;  %v440_v51 = vld [vmem:[%s1698_s14 + $0x738] sm:$0xff]  ;;  %v951_v56 = vadd.f32 %v695_v49, %v439_v48  ;;  %v715_v45 = vld [vmem:[%s1705_s26 + $0x7d0] sm:$0xff] }
 0x10e   : > { %1185 = vst [vmem:[%s1720_s20 + $0x680] sm:$0xff] %v929_v54  ;;  %v441_v54 = vld [vmem:[%s1698_s14 + $0x740] sm:$0xff]  ;;  %v952_v59 = vadd.f32 %v696_v52, %v440_v51  ;;  %v716_v48 = vld [vmem:[%s1705_s26 + $0x7d8] sm:$0xff] }
 0x10f   : > { %1186 = vst [vmem:[%s1720_s20 + $0x688] sm:$0xff] %v930_v57  ;;  %v442_v57 = vld [vmem:[%s1698_s14 + $0x748] sm:$0xff]  ;;  %v953_v62 = vadd.f32 %v697_v55, %v441_v54  ;;  %v717_v51 = vld [vmem:[%s1705_s26 + $0x7e0] sm:$0xff] }
 0x110   : > { %1187 = vst [vmem:[%s1720_s20 + $0x690] sm:$0xff] %v931_v60  ;;  %v443_v60 = vld [vmem:[%s1698_s14 + $0x750] sm:$0xff]  ;;  %v954_v1 = vadd.f32 %v698_v58, %v442_v57  ;;  %v718_v54 = vld [vmem:[%s1705_s26 + $0x7e8] sm:$0xff] }
 0x111   : > { %1188 = vst [vmem:[%s1720_s20 + $0x698] sm:$0xff] %v932_v63  ;;  %v444_v63 = vld [vmem:[%s1698_s14 + $0x758] sm:$0xff]  ;;  %v955_v4 = vadd.f32 %v699_v61, %v443_v60  ;;  %v719_v57 = vld [vmem:[%s1705_s26 + $0x7f0] sm:$0xff] }
 0x112   : > { %1189 = vst [vmem:[%s1720_s20 + $0x6a0] sm:$0xff] %v933_v2  ;;  %v445_v2 = vld [vmem:[%s1698_s14 + $0x760] sm:$0xff]  ;;  %v956_v7 = vadd.f32 %v700_v0, %v444_v63  ;;  %v720_v60 = vld [vmem:[%s1705_s26 + $0x7f8] sm:$0xff] }
 0x113   : > { %1190 = vst [vmem:[%s1720_s20 + $0x6a8] sm:$0xff] %v934_v5  ;;  %v446_v5 = vld [vmem:[%s1698_s14 + $0x768] sm:$0xff]  ;;  %v957_v10 = vadd.f32 %v701_v3, %v445_v2 }
 0x114   : > { %1191 = vst [vmem:[%s1720_s20 + $0x6b0] sm:$0xff] %v935_v8  ;;  %v447_v8 = vld [vmem:[%s1698_s14 + $0x770] sm:$0xff]  ;;  %v958_v13 = vadd.f32 %v702_v6, %v446_v5 }
 0x115   : > { %1192 = vst [vmem:[%s1720_s20 + $0x6b8] sm:$0xff] %v936_v11  ;;  %v448_v11 = vld [vmem:[%s1698_s14 + $0x778] sm:$0xff]  ;;  %v959_v16 = vadd.f32 %v703_v9, %v447_v8 }
 0x116   : > { %1193 = vst [vmem:[%s1720_s20 + $0x6c0] sm:$0xff] %v937_v14  ;;  %v449_v14 = vld [vmem:[%s1698_s14 + $0x780] sm:$0xff]  ;;  %v960_v19 = vadd.f32 %v704_v12, %v448_v11 }
 0x117   : > { %1194 = vst [vmem:[%s1720_s20 + $0x6c8] sm:$0xff] %v938_v17  ;;  %v450_v17 = vld [vmem:[%s1698_s14 + $0x788] sm:$0xff]  ;;  %v961_v22 = vadd.f32 %v705_v15, %v449_v14 }
 0x118   : > { %1195 = vst [vmem:[%s1720_s20 + $0x6d0] sm:$0xff] %v939_v20  ;;  %v451_v20 = vld [vmem:[%s1698_s14 + $0x790] sm:$0xff]  ;;  %v962_v25 = vadd.f32 %v706_v18, %v450_v17 }
 0x119   : > { %1196 = vst [vmem:[%s1720_s20 + $0x6d8] sm:$0xff] %v940_v23  ;;  %v452_v23 = vld [vmem:[%s1698_s14 + $0x798] sm:$0xff]  ;;  %v963_v28 = vadd.f32 %v707_v21, %v451_v20 }
 0x11a   : > { %1197 = vst [vmem:[%s1720_s20 + $0x6e0] sm:$0xff] %v941_v26  ;;  %v453_v26 = vld [vmem:[%s1698_s14 + $0x7a0] sm:$0xff]  ;;  %v964_v31 = vadd.f32 %v708_v24, %v452_v23 }
 0x11b   : > { %1198 = vst [vmem:[%s1720_s20 + $0x6e8] sm:$0xff] %v942_v29  ;;  %v454_v29 = vld [vmem:[%s1698_s14 + $0x7a8] sm:$0xff]  ;;  %v965_v34 = vadd.f32 %v709_v27, %v453_v26 }
 0x11c   : > { %1199 = vst [vmem:[%s1720_s20 + $0x6f0] sm:$0xff] %v943_v32  ;;  %v455_v32 = vld [vmem:[%s1698_s14 + $0x7b0] sm:$0xff]  ;;  %v966_v37 = vadd.f32 %v710_v30, %v454_v29 }
 0x11d   : > { %1200 = vst [vmem:[%s1720_s20 + $0x6f8] sm:$0xff] %v944_v35  ;;  %v456_v35 = vld [vmem:[%s1698_s14 + $0x7b8] sm:$0xff]  ;;  %v967_v40 = vadd.f32 %v711_v33, %v455_v32 }
 0x11e   : > { %1201 = vst [vmem:[%s1720_s20 + $0x700] sm:$0xff] %v945_v38  ;;  %v457_v38 = vld [vmem:[%s1698_s14 + $0x7c0] sm:$0xff]  ;;  %v968_v43 = vadd.f32 %v712_v36, %v456_v35 }
 0x11f   : > { %1202 = vst [vmem:[%s1720_s20 + $0x708] sm:$0xff] %v946_v41  ;;  %v458_v41 = vld [vmem:[%s1698_s14 + $0x7c8] sm:$0xff]  ;;  %v969_v46 = vadd.f32 %v713_v39, %v457_v38 }
 0x120   : > { %1203 = vst [vmem:[%s1720_s20 + $0x710] sm:$0xff] %v947_v44  ;;  %v459_v44 = vld [vmem:[%s1698_s14 + $0x7d0] sm:$0xff]  ;;  %v970_v49 = vadd.f32 %v714_v42, %v458_v41 }
 0x121   : > { %1204 = vst [vmem:[%s1720_s20 + $0x718] sm:$0xff] %v948_v47  ;;  %v460_v47 = vld [vmem:[%s1698_s14 + $0x7d8] sm:$0xff]  ;;  %v971_v52 = vadd.f32 %v715_v45, %v459_v44 }
 0x122   : > { %1205 = vst [vmem:[%s1720_s20 + $0x720] sm:$0xff] %v949_v50  ;;  %v461_v50 = vld [vmem:[%s1698_s14 + $0x7e0] sm:$0xff]  ;;  %v972_v55 = vadd.f32 %v716_v48, %v460_v47 }
 0x123   : > { %1206 = vst [vmem:[%s1720_s20 + $0x728] sm:$0xff] %v950_v53  ;;  %v462_v53 = vld [vmem:[%s1698_s14 + $0x7e8] sm:$0xff]  ;;  %v973_v58 = vadd.f32 %v717_v51, %v461_v50 }
 0x124   : > { %1207 = vst [vmem:[%s1720_s20 + $0x730] sm:$0xff] %v951_v56  ;;  %v463_v56 = vld [vmem:[%s1698_s14 + $0x7f0] sm:$0xff]  ;;  %v974_v61 = vadd.f32 %v718_v54, %v462_v53 }
 0x125   : > { %1208 = vst [vmem:[%s1720_s20 + $0x738] sm:$0xff] %v952_v59  ;;  %v464_v59 = vld [vmem:[%s1698_s14 + $0x7f8] sm:$0xff] }
 0x126   : > { %1209 = vst [vmem:[%s1720_s20 + $0x740] sm:$0xff] %v953_v62  ;;  %v975_v62 = vadd.f32 %v719_v57, %v463_v56  ;;  %v976_v63 = vadd.f32 %v720_v60, %v464_v59 }
 0x127   : > { %1210 = vst [vmem:[%s1720_s20 + $0x748] sm:$0xff] %v954_v1 }
 0x128   : > { %1211 = vst [vmem:[%s1720_s20 + $0x750] sm:$0xff] %v955_v4 }
 0x129   : > { %1212 = vst [vmem:[%s1720_s20 + $0x758] sm:$0xff] %v956_v7 }
 0x12a   : > { %1213 = vst [vmem:[%s1720_s20 + $0x760] sm:$0xff] %v957_v10 }
 0x12b   : > { %1214 = vst [vmem:[%s1720_s20 + $0x768] sm:$0xff] %v958_v13 }
 0x12c   : > { %1215 = vst [vmem:[%s1720_s20 + $0x770] sm:$0xff] %v959_v16 }
 0x12d   : > { %1216 = vst [vmem:[%s1720_s20 + $0x778] sm:$0xff] %v960_v19 }
 0x12e   : > { %1217 = vst [vmem:[%s1720_s20 + $0x780] sm:$0xff] %v961_v22 }
 0x12f   : > { %1218 = vst [vmem:[%s1720_s20 + $0x788] sm:$0xff] %v962_v25 }
 0x130   : > { %1219 = vst [vmem:[%s1720_s20 + $0x790] sm:$0xff] %v963_v28 }
 0x131   : > { %1220 = vst [vmem:[%s1720_s20 + $0x798] sm:$0xff] %v964_v31 }
 0x132   : > { %1221 = vst [vmem:[%s1720_s20 + $0x7a0] sm:$0xff] %v965_v34 }
 0x133   : > { %1222 = vst [vmem:[%s1720_s20 + $0x7a8] sm:$0xff] %v966_v37 }
 0x134   : > { %1223 = vst [vmem:[%s1720_s20 + $0x7b0] sm:$0xff] %v967_v40 }
 0x135   : > { %1224 = vst [vmem:[%s1720_s20 + $0x7b8] sm:$0xff] %v968_v43 }
 0x136   : > { %1225 = vst [vmem:[%s1720_s20 + $0x7c0] sm:$0xff] %v969_v46 }
 0x137   : > { %1226 = vst [vmem:[%s1720_s20 + $0x7c8] sm:$0xff] %v970_v49 }
 0x138   : > { %1227 = vst [vmem:[%s1720_s20 + $0x7d0] sm:$0xff] %v971_v52 }
 0x139   : > { %1228 = vst [vmem:[%s1720_s20 + $0x7d8] sm:$0xff] %v972_v55 }
 0x13a   : > { %1229 = vst [vmem:[%s1720_s20 + $0x7e0] sm:$0xff] %v973_v58 }
 0x13b   : > { %1230 = vst [vmem:[%s1720_s20 + $0x7e8] sm:$0xff] %v974_v61 }
 0x13c   : > { %1231 = vst [vmem:[%s1720_s20 + $0x7f0] sm:$0xff] %v975_v62 }
 0x13d   : > { %1232 = vst [vmem:[%s1720_s20 + $0x7f8] sm:$0xff] %v976_v63 }
 0x13e   : > { %1508 = shalt.err (!%p1505_p0)
}
 0x13f   : > { %s1555_s23 = smov 128   ;;  %s1556_s7 = smov 8  }
 0x140   : > { %1370 = dma.vmem_to_hbm [thread:$0]  (%p1622_p11), %s1247_s16, 32768, %s1249_s17, %s1234_s19, %s1555_s23, %s1555_s23, %s1556_s7  }
 0x141 PF: > { %s1263_s14 = sand.u32 1, %s1539_s9   ;;  %p2524_p1 = scmp.ge.s32.totalorder %s1551_s12, 2 }
 0x142   : > { %s1264_s4 = scalar_lea.sflag [#allocation4], %s1263_s14 }
 0x143   : > { %p1380_p4 = pnand %p2524_p1, %p1626_p12 }
 0x145   : > { %p1381_p7 = pneg %p1380_p4 }
 0x147   : > { %1534 = dma.done.wait (%p1381_p7), %s1264_s4, 32768  }
 0x148   : > { %1536 = vsyncadd (%p1381_p7), %s1264_s4, 4294934528  ;;  %p18_p5 = scmp.ge.s32.totalorder %s1597_s15, 4   ;;  %s2525_s9 = smov %s1543_s10 }
 0x149   : > { %s2526_s10 = smov %s1547_s11  ;;  %s2527_s11 = smov %s1609_s18 }
 0x14a   : > { %s2528_s12 = smov %s1597_s15  ;;  %20 = sbr.rel (!%p18_p5) target bundleno = 7 (0x7), region = 86 }
 0x14f   :  { %1270 = vsyncpa [#allocation3], 1 }
 0x150   :  { %1272 = vsyncpa [#allocation3 + $0x1], 1 }
 0x151   :  { %1273 = vsyncpa [#allocation6], 1 }
 0x152   :  { %1275 = vsyncpa [#allocation6 + $0x1], 1 }
 0x153   :  { %1276 = vsyncpa [#allocation4], 1 }
 0x154   :  { %1278 = vsyncpa [#allocation4 + $0x1], 1 }

</bundles_post_ra>
